<compile_context>
chip_gen: v7x
topology: tpu7x:2x2x1
jax: 0.10.0
libtpu: 0.0.40
codegen_flags: <defaults>
</compile_context>

<pallas_src>
import math

import jax
import jax.numpy as jnp
from jax.experimental import pallas as pl
from jax.experimental.pallas import tpu as pltpu

EPS = 1e-5
HIDDEN = 32
HP = jax.lax.Precision.HIGHEST


def _mlp_kernel(x_ref, slab_ref, o_ref):
    # x_ref:    (1, B)       one independent batch, samples on the lane axis
    # slab_ref: (H+8, H+8)   packed parameters:
    #             [:H, :H]      W2 (out, in)
    #             [:H, H+0]     w1*g0      (BN0 gamma folded into layer-1 W)
    #             [:H, H+1]     b1 + w1*be0 (BN0 beta folded into layer-1 b)
    #             [:H, H+2..6]  g1, be1, b2, g2, be2
    #             [H,  :H]      W3 row
    #             [H,   H]      b3
    # o_ref:    (1, B)
    H = slab_ref.shape[0] - 8
    B = x_ref.shape[-1]
    inv_b = 1.0 / B

    x = x_ref[...]                                   # (1, B)

    # Parameters: static slices straight off the packed slab (views, no full
    # padded-tile materialization).
    w2 = slab_ref[0:H, 0:H]                          # (H, H)
    w1g = slab_ref[0:H, H + 0:H + 1]                 # (H, 1)
    b1e = slab_ref[0:H, H + 1:H + 2]
    g1 = slab_ref[0:H, H + 2:H + 3]
    be1 = slab_ref[0:H, H + 3:H + 4]
    b2 = slab_ref[0:H, H + 4:H + 5]
    g2 = slab_ref[0:H, H + 5:H + 6]
    be2 = slab_ref[0:H, H + 6:H + 7]
    w3r = slab_ref[H:H + 1, 0:H]                     # (1, H)
    b3 = slab_ref[H:H + 1, H:H + 1]                  # (1, 1)

    ones_b = jnp.ones((B, 1), jnp.float32)           # for MXU row-sums

    # ---- BatchNorm1d(1) folded into Linear(1 -> H), then ReLU -------------
    # One stacked lane reduction for mean and second moment.
    s = jnp.sum(jnp.concatenate([x, x * x], axis=0), axis=1, keepdims=True) * inv_b
    mu0, ex0 = s[0:1], s[1:2]                        # (1, 1) each
    r0 = jax.lax.rsqrt(jnp.maximum(ex0 - mu0 * mu0, 0.0) + EPS)
    # w1*(g0*(x-mu0)*r0 + be0) + b1 == (w1*g0)*((x-mu0)*r0) + (w1*be0 + b1)
    h = jnp.maximum(w1g * ((x - mu0) * r0) + b1e, 0.0)          # (H, B)

    # ---- BatchNorm1d(H) folded into Linear(H -> H), then ReLU -------------
    # One-pass stats on the otherwise-idle MXU: [h; h*h] @ ones(B,1).
    stats = jnp.dot(jnp.concatenate([h, h * h], axis=0), ones_b,
                    preferred_element_type=jnp.float32, precision=HP) * inv_b
    mu1, ex1 = stats[0:H], stats[H:2 * H]                        # (H, 1)
    s1 = g1 * jax.lax.rsqrt(jnp.maximum(ex1 - mu1 * mu1, 0.0) + EPS)
    t1 = be1 - mu1 * s1
    # Single big matmul; shift folded in as a broadcast add (no N=1 matmul).
    h = jnp.dot(w2, s1 * h + t1,
                preferred_element_type=jnp.float32, precision=HP) + b2
    h = jnp.maximum(h, 0.0)                                      # (H, B)

    # ---- BatchNorm1d(H) folded into Linear(H -> 1) -------------------------
    stats = jnp.dot(jnp.concatenate([h, h * h], axis=0), ones_b,
                    preferred_element_type=jnp.float32, precision=HP) * inv_b
    mu2, ex2 = stats[0:H], stats[H:2 * H]
    s2 = g2 * jax.lax.rsqrt(jnp.maximum(ex2 - mu2 * mu2, 0.0) + EPS)
    t2 = be2 - mu2 * s2
    # Final layer on the MXU: (1,H) @ (H,B).
    o_ref[...] = jnp.dot(w3r, s2 * h + t2,
                         preferred_element_type=jnp.float32, precision=HP) + b3


def linear_forward(x_batches, slab):
    """x_batches: (G, B) float32 — G independent batches of B scalar samples.

    Each row is one BatchNorm batch (stats are computed per row).  Returns the
    (G, B) float32 module output.  B should be a multiple of 128 (>=256 fills
    the v6e/v7x MXU).
    """
    G, B = x_batches.shape
    H = slab.shape[0] - 8
    x3 = x_batches.reshape(G, 1, B)      # metadata-only reshape, lane-dense

    out = pl.pallas_call(
        _mlp_kernel,
        out_shape=jax.ShapeDtypeStruct((G, 1, B), jnp.float32),
        grid_spec=pltpu.PrefetchScalarGridSpec(
            num_scalar_prefetch=0,
            grid=(G,),
            in_specs=[
                # One independent batch per grid step.
                pl.BlockSpec((None, 1, B), lambda g: (g, 0, 0)),
                # Whole parameter slab, same block every step (fetched once).
                pl.BlockSpec((H + 8, H + 8), lambda g: (0, 0)),
            ],
            out_specs=pl.BlockSpec((None, 1, B), lambda g: (g, 0, 0)),
        ),
        compiler_params=pltpu.CompilerParams(
            # Independent batches -> both TensorCores on v7x; no-op on v5e/v6e.
            dimension_semantics=("parallel",)),
    )(x3, slab)
    return out.reshape(G, B)


def pack_params(torch_params, hidden=HIDDEN):
    """Pack all module parameters into one (H+8, H+8) float32 slab."""
    (g0, be0, W1, b1, g1, be1, W2, b2, g2, be2, W3, b3) = torch_params
    H = hidden
    cols = jnp.stack([
        W1[:, 0] * g0,            # BN0 gamma folded into layer-1 weight
        b1 + W1[:, 0] * be0,      # BN0 beta folded into layer-1 bias
        g1, be1, b2, g2, be2,
    ], axis=1)                    # (H, 7)
    slab = jnp.zeros((H + 8, H + 8), jnp.float32)
    slab = slab.at[:H, :H].set(W2)
    slab = slab.at[:H, H:H + 7].set(cols)
    slab = slab.at[H, :H].set(W3[0, :])
    slab = slab.at[H, H].set(b3)
    return slab


def init_params(key, hidden=HIDDEN):
    """Torch-like Linear init; BN affine params perturbed from (1, 0) so the
    gamma/beta folding paths are actually exercised.  Returns (slab, torch)."""
    ks = jax.random.split(key, 12)

    def unif(k, shape, fan_in):
        bound = 1.0 / math.sqrt(fan_in)
        return jax.random.uniform(k, shape, jnp.float32, -bound, bound)

    g0 = 1.0 + 0.1 * jax.random.normal(ks[6], (), jnp.float32)
    be0 = 0.1 * jax.random.normal(ks[7], (), jnp.float32)
    W1 = unif(ks[0], (hidden, 1), 1)
    b1 = unif(ks[1], (hidden,), 1)
    g1 = 1.0 + 0.1 * jax.random.normal(ks[8], (hidden,), jnp.float32)
    be1 = 0.1 * jax.random.normal(ks[9], (hidden,), jnp.float32)
    W2 = unif(ks[2], (hidden, hidden), hidden)
    b2 = unif(ks[3], (hidden,), hidden)
    g2 = 1.0 + 0.1 * jax.random.normal(ks[10], (hidden,), jnp.float32)
    be2 = 0.1 * jax.random.normal(ks[11], (hidden,), jnp.float32)
    W3 = unif(ks[4], (1, hidden), hidden)
    b3 = unif(ks[5], (1,), hidden)[0]

    torch_params = (g0, be0, W1, b1, g1, be1, W2, b2, g2, be2, W3, b3)
    return pack_params(torch_params, hidden), torch_params


def reference_forward(x_batches, torch_params):
    """Pure-JAX reference, PyTorch semantics, applied per independent batch."""
    (g0, be0, W1, b1, g1, be1, W2, b2, g2, be2, W3, b3) = torch_params

    def bn(v, g, b):
        mu = jnp.mean(v, axis=0, keepdims=True)
        var = jnp.mean((v - mu) ** 2, axis=0, keepdims=True)
        return (v - mu) * jax.lax.rsqrt(var + EPS) * g + b

    def one(xb):                                   # xb: (B,)
        h = bn(xb[:, None], g0, be0)
        h = jnp.maximum(jnp.dot(h, W1.T, precision=HP) + b1, 0.0)
        h = bn(h, g1, be1)
        h = jnp.maximum(jnp.dot(h, W2.T, precision=HP) + b2, 0.0)
        h = bn(h, g2, be2)
        return (jnp.dot(h, W3.T, precision=HP) + b3)[:, 0]

    return jax.vmap(one)(x_batches)


if __name__ == "__main__":
    key = jax.random.PRNGKey(0)
    G, B = 4, 256          # 4 independent batches, 256 lane-dense samples each

    slab, torch_params = init_params(key, HIDDEN)
    # Deterministic inputs consistent with the original script's linspace data;
    # each row is one independent BatchNorm batch.
    x = jnp.linspace(0.0, 2.0 * math.pi, G * B, dtype=jnp.float32).reshape(G, B)

    out = jax.block_until_ready(linear_forward(x, slab))
    ref = reference_forward(x, torch_params)

    assert out.shape == (G, B)
    err = float(jnp.max(jnp.abs(out - ref)))
    # One-pass variance (E[h^2]-mu^2) trades a little accuracy for a shorter
    # reduction chain; 1e-3 is comfortably met at these magnitudes.
    assert jnp.allclose(out, ref, atol=1e-3, rtol=1e-3), err

    print("KERNEL_OK")
</pallas_src>

<mosaic_0001>
module attributes {stable_mosaic.version = 11 : i64} {
  func.func @_mlp_kernel(%arg0: i32, %arg1: memref<1x1x256xf32, #tpu.memory_space<vmem>>, %arg2: memref<40x40xf32, #tpu.memory_space<vmem>>, %arg3: memref<1x1x256xf32, #tpu.memory_space<vmem>>) attributes {dimension_semantics = [#tpu.dimension_semantics<parallel>], iteration_bounds = array<i64: 4>, scalar_prefetch = 0 : i64, scratch_operands = 0 : i64, tpu.core_type = #tpu.core_type<tc>, window_params = [{transform_indices = @transform_0, window_bounds = array<i64: 1, 1, 256>}, {pipeline_mode = #tpu.pipeline_mode<synchronous>, transform_indices = @transform_1, window_bounds = array<i64: 40, 40>}, {transform_indices = @transform_2, window_bounds = array<i64: 1, 1, 256>}]} {
    %c0 = arith.constant 0 : index
    %c0_0 = arith.constant 0 : index
    %c0_1 = arith.constant 0 : index
    %0 = vector.load %arg1[%c0, %c0_0, %c0_1] : memref<1x1x256xf32, #tpu.memory_space<vmem>>, vector<1x1x256xf32>
    %1 = vector.shape_cast %0 : vector<1x1x256xf32> to vector<1x256xf32>
    %c0_2 = arith.constant 0 : index
    %c0_3 = arith.constant 0 : index
    %2 = vector.load %arg2[%c0_2, %c0_3] : memref<40x40xf32, #tpu.memory_space<vmem>>, vector<32x32xf32>
    %c0_4 = arith.constant 0 : index
    %c32 = arith.constant 32 : index
    %3 = vector.load %arg2[%c0_4, %c32] : memref<40x40xf32, #tpu.memory_space<vmem>>, vector<32x1xf32>
    %c0_5 = arith.constant 0 : index
    %c33 = arith.constant 33 : index
    %4 = vector.load %arg2[%c0_5, %c33] : memref<40x40xf32, #tpu.memory_space<vmem>>, vector<32x1xf32>
    %c0_6 = arith.constant 0 : index
    %c34 = arith.constant 34 : index
    %5 = vector.load %arg2[%c0_6, %c34] : memref<40x40xf32, #tpu.memory_space<vmem>>, vector<32x1xf32>
    %c0_7 = arith.constant 0 : index
    %c35 = arith.constant 35 : index
    %6 = vector.load %arg2[%c0_7, %c35] : memref<40x40xf32, #tpu.memory_space<vmem>>, vector<32x1xf32>
    %c0_8 = arith.constant 0 : index
    %c36 = arith.constant 36 : index
    %7 = vector.load %arg2[%c0_8, %c36] : memref<40x40xf32, #tpu.memory_space<vmem>>, vector<32x1xf32>
    %c0_9 = arith.constant 0 : index
    %c37 = arith.constant 37 : index
    %8 = vector.load %arg2[%c0_9, %c37] : memref<40x40xf32, #tpu.memory_space<vmem>>, vector<32x1xf32>
    %c0_10 = arith.constant 0 : index
    %c38 = arith.constant 38 : index
    %9 = vector.load %arg2[%c0_10, %c38] : memref<40x40xf32, #tpu.memory_space<vmem>>, vector<32x1xf32>
    %c32_11 = arith.constant 32 : index
    %c0_12 = arith.constant 0 : index
    %10 = vector.load %arg2[%c32_11, %c0_12] : memref<40x40xf32, #tpu.memory_space<vmem>>, vector<1x32xf32>
    %c32_13 = arith.constant 32 : index
    %c32_14 = arith.constant 32 : index
    %11 = vector.load %arg2[%c32_13, %c32_14] : memref<40x40xf32, #tpu.memory_space<vmem>>, vector<1x1xf32>
    %cst = arith.constant 1.000000e+00 : f32
    %12 = vector.broadcast %cst : f32 to vector<256x1xf32>
    %13 = arith.mulf %1, %1 : vector<1x256xf32>
    %14 = tpu.concatenate %1, %13 in 0 : vector<1x256xf32>, vector<1x256xf32> -> vector<2x256xf32>
    %cst_15 = arith.constant dense<0.000000e+00> : vector<2xf32>
    %15 = vector.multi_reduction <add>, %14, %cst_15 [1] : vector<2x256xf32> to vector<2xf32>
    %16 = vector.shape_cast %15 : vector<2xf32> to vector<2x1xf32>
    %cst_16 = arith.constant 3.906250e-03 : f32
    %17 = vector.broadcast %cst_16 : f32 to vector<2x1xf32>
    %18 = arith.mulf %16, %17 : vector<2x1xf32>
    %19 = vector.extract_strided_slice %18 {offsets = [0, 0], sizes = [1, 1], strides = [1, 1]} : vector<2x1xf32> to vector<1x1xf32>
    %20 = vector.extract_strided_slice %18 {offsets = [1, 0], sizes = [1, 1], strides = [1, 1]} : vector<2x1xf32> to vector<1x1xf32>
    %21 = arith.mulf %19, %19 : vector<1x1xf32>
    %22 = arith.subf %20, %21 : vector<1x1xf32>
    %cst_17 = arith.constant 0.000000e+00 : f32
    %23 = vector.broadcast %cst_17 : f32 to vector<1x1xf32>
    %24 = arith.maximumf %22, %23 : vector<1x1xf32>
    %cst_18 = arith.constant 9.99999974E-6 : f32
    %25 = vector.broadcast %cst_18 : f32 to vector<1x1xf32>
    %26 = arith.addf %24, %25 : vector<1x1xf32>
    %27 = math.rsqrt %26 : vector<1x1xf32>
    %28 = vector.broadcast %19 : vector<1x1xf32> to vector<1x256xf32>
    %29 = arith.subf %1, %28 : vector<1x256xf32>
    %30 = vector.broadcast %27 : vector<1x1xf32> to vector<1x256xf32>
    %31 = arith.mulf %29, %30 : vector<1x256xf32>
    %32 = vector.broadcast %3 : vector<32x1xf32> to vector<32x256xf32>
    %33 = vector.broadcast %31 : vector<1x256xf32> to vector<32x256xf32>
    %34 = arith.mulf %32, %33 : vector<32x256xf32>
    %35 = vector.broadcast %4 : vector<32x1xf32> to vector<32x256xf32>
    %36 = arith.addf %34, %35 : vector<32x256xf32>
    %cst_19 = arith.constant 0.000000e+00 : f32
    %37 = vector.broadcast %cst_19 : f32 to vector<32x256xf32>
    %38 = arith.maximumf %36, %37 : vector<32x256xf32>
    %39 = arith.mulf %38, %38 : vector<32x256xf32>
    %40 = tpu.concatenate %38, %39 in 0 : vector<32x256xf32>, vector<32x256xf32> -> vector<64x256xf32>
    %cst_20 = arith.constant dense<0.000000e+00> : vector<64x1xf32>
    %41 = tpu.matmul %40, %12, %cst_20 {dimension_numbers = #tpu.dot_dimension_numbers<[1], [0], [0], [1], [0, 0, 1, 1], [], []>, precision = #tpu.contract_precision<fp32>} : vector<64x256xf32>, vector<256x1xf32>, vector<64x1xf32> -> vector<64x1xf32>
    %cst_21 = arith.constant 3.906250e-03 : f32
    %42 = vector.broadcast %cst_21 : f32 to vector<64x1xf32>
    %43 = arith.mulf %41, %42 : vector<64x1xf32>
    %44 = vector.extract_strided_slice %43 {offsets = [0, 0], sizes = [32, 1], strides = [1, 1]} : vector<64x1xf32> to vector<32x1xf32>
    %45 = vector.extract_strided_slice %43 {offsets = [32, 0], sizes = [32, 1], strides = [1, 1]} : vector<64x1xf32> to vector<32x1xf32>
    %46 = arith.mulf %44, %44 : vector<32x1xf32>
    %47 = arith.subf %45, %46 : vector<32x1xf32>
    %cst_22 = arith.constant 0.000000e+00 : f32
    %48 = vector.broadcast %cst_22 : f32 to vector<32x1xf32>
    %49 = arith.maximumf %47, %48 : vector<32x1xf32>
    %cst_23 = arith.constant 9.99999974E-6 : f32
    %50 = vector.broadcast %cst_23 : f32 to vector<32x1xf32>
    %51 = arith.addf %49, %50 : vector<32x1xf32>
    %52 = math.rsqrt %51 : vector<32x1xf32>
    %53 = arith.mulf %5, %52 : vector<32x1xf32>
    %54 = arith.mulf %44, %53 : vector<32x1xf32>
    %55 = arith.subf %6, %54 : vector<32x1xf32>
    %56 = vector.broadcast %53 : vector<32x1xf32> to vector<32x256xf32>
    %57 = arith.mulf %56, %38 : vector<32x256xf32>
    %58 = vector.broadcast %55 : vector<32x1xf32> to vector<32x256xf32>
    %59 = arith.addf %57, %58 : vector<32x256xf32>
    %cst_24 = arith.constant dense<0.000000e+00> : vector<32x256xf32>
    %60 = tpu.matmul %2, %59, %cst_24 {dimension_numbers = #tpu.dot_dimension_numbers<[1], [0], [0], [1], [0, 0, 1, 1], [], []>, precision = #tpu.contract_precision<fp32>} : vector<32x32xf32>, vector<32x256xf32>, vector<32x256xf32> -> vector<32x256xf32>
    %61 = vector.broadcast %7 : vector<32x1xf32> to vector<32x256xf32>
    %62 = arith.addf %60, %61 : vector<32x256xf32>
    %cst_25 = arith.constant 0.000000e+00 : f32
    %63 = vector.broadcast %cst_25 : f32 to vector<32x256xf32>
    %64 = arith.maximumf %62, %63 : vector<32x256xf32>
    %65 = arith.mulf %64, %64 : vector<32x256xf32>
    %66 = tpu.concatenate %64, %65 in 0 : vector<32x256xf32>, vector<32x256xf32> -> vector<64x256xf32>
    %cst_26 = arith.constant dense<0.000000e+00> : vector<64x1xf32>
    %67 = tpu.matmul %66, %12, %cst_26 {dimension_numbers = #tpu.dot_dimension_numbers<[1], [0], [0], [1], [0, 0, 1, 1], [], []>, precision = #tpu.contract_precision<fp32>} : vector<64x256xf32>, vector<256x1xf32>, vector<64x1xf32> -> vector<64x1xf32>
    %cst_27 = arith.constant 3.906250e-03 : f32
    %68 = vector.broadcast %cst_27 : f32 to vector<64x1xf32>
    %69 = arith.mulf %67, %68 : vector<64x1xf32>
    %70 = vector.extract_strided_slice %69 {offsets = [0, 0], sizes = [32, 1], strides = [1, 1]} : vector<64x1xf32> to vector<32x1xf32>
    %71 = vector.extract_strided_slice %69 {offsets = [32, 0], sizes = [32, 1], strides = [1, 1]} : vector<64x1xf32> to vector<32x1xf32>
    %72 = arith.mulf %70, %70 : vector<32x1xf32>
    %73 = arith.subf %71, %72 : vector<32x1xf32>
    %cst_28 = arith.constant 0.000000e+00 : f32
    %74 = vector.broadcast %cst_28 : f32 to vector<32x1xf32>
    %75 = arith.maximumf %73, %74 : vector<32x1xf32>
    %cst_29 = arith.constant 9.99999974E-6 : f32
    %76 = vector.broadcast %cst_29 : f32 to vector<32x1xf32>
    %77 = arith.addf %75, %76 : vector<32x1xf32>
    %78 = math.rsqrt %77 : vector<32x1xf32>
    %79 = arith.mulf %8, %78 : vector<32x1xf32>
    %80 = arith.mulf %70, %79 : vector<32x1xf32>
    %81 = arith.subf %9, %80 : vector<32x1xf32>
    %82 = vector.broadcast %79 : vector<32x1xf32> to vector<32x256xf32>
    %83 = arith.mulf %82, %64 : vector<32x256xf32>
    %84 = vector.broadcast %81 : vector<32x1xf32> to vector<32x256xf32>
    %85 = arith.addf %83, %84 : vector<32x256xf32>
    %cst_30 = arith.constant dense<0.000000e+00> : vector<1x256xf32>
    %86 = tpu.matmul %10, %85, %cst_30 {dimension_numbers = #tpu.dot_dimension_numbers<[1], [0], [0], [1], [0, 0, 1, 1], [], []>, precision = #tpu.contract_precision<fp32>} : vector<1x32xf32>, vector<32x256xf32>, vector<1x256xf32> -> vector<1x256xf32>
    %87 = vector.broadcast %11 : vector<1x1xf32> to vector<1x256xf32>
    %88 = arith.addf %86, %87 : vector<1x256xf32>
    %c0_31 = arith.constant 0 : index
    %c0_32 = arith.constant 0 : index
    %c0_33 = arith.constant 0 : index
    %89 = vector.load %arg3[%c0_31, %c0_32, %c0_33] : memref<1x1x256xf32, #tpu.memory_space<vmem>>, vector<1x1x256xf32>
    %90 = vector.shape_cast %89 : vector<1x1x256xf32> to vector<1x256xf32>
    %91 = vector.shape_cast %88 : vector<1x256xf32> to vector<1x1x256xf32>
    tpu.vector_store %arg3[%c0_31, %c0_32, %c0_33], %91 {strides = array<i32>} : memref<1x1x256xf32, #tpu.memory_space<vmem>>, vector<1x1x256xf32>,
    return
  }
  func.func @transform_0(%arg0: i32) -> (i32, i32, i32) {
    %c0_i32 = arith.constant 0 : i32
    %c0_i32_0 = arith.constant 0 : i32
    %c0_i32_1 = arith.constant 0 : i32
    return %arg0, %c0_i32, %c0_i32_0 : i32, i32, i32
  }
  func.func @transform_1(%arg0: i32) -> (i32, i32) {
    %c0_i32 = arith.constant 0 : i32
    %c0_i32_0 = arith.constant 0 : i32
    %c0_i32_1 = arith.constant 0 : i32
    return %c0_i32, %c0_i32_0 : i32, i32
  }
  func.func @transform_2(%arg0: i32) -> (i32, i32, i32) {
    %c0_i32 = arith.constant 0 : i32
    %c0_i32_0 = arith.constant 0 : i32
    %c0_i32_1 = arith.constant 0 : i32
    return %arg0, %c0_i32, %c0_i32_0 : i32, i32, i32
  }
}

</mosaic_0001>

<bundles_post_ra>
// kernel: tpu_custom_call.1
= control target key start
LH: loop header
LB: loop body
LE: loop exit
PB: predicated region body
PF: predicated region fallthrough
CT: control target
= control target key end

     0   :  { %7 = vsyncpa [#allocation3], 0  ;;  %s5821_s0 = inlined_call_operand.hbm [shape: f32[4,1,256], index: 0, kind: input, shape index: {}]   ;;  %s5822_s1 = inlined_call_operand.hbm [shape: f32[40,40], index: 1, kind: input, shape index: {}]   ;;  %s5823_s2 = inlined_call_operand.hbm [shape: f32[4,1,256], index: 2, kind: output, shape index: {}]  }
   0x1   :  { %9 = vsyncpa [#allocation3 + $0x1], 0 }
   0x2   :  { %10 = vsyncpa [#allocation6], 0 }
   0x3   :  { %11 = vsyncpa [#allocation4], 0 }
   0x4   :  { %13 = vsyncpa [#allocation4 + $0x1], 0  ;;  %s4585_s9 = smov 0   ;;  %s4587_s10 = smov 0  }
   0x5   :  { %s4589_s11 = smov 0   ;;  %s4591_s12 = smov 0  }
   0x6 LB: > { %s4606_s13 = sadd.s32 4294967295, %s4546_s12   ;;  %s3673_s14 = sadd.s32 4294967294, %s4546_s12   ;;  %s4546_s12 = sphi %s4591_s12, %s5857_s12   ;;  %s4542_s11 = sphi %s4589_s11, %s5856_s11   ;;  %s4538_s10 = sphi %s4587_s10, %s5855_s10   ;;  %s4534_s9 = sphi %s4585_s9, %s5854_s9  }
   0x7   : > { %p39_p0 = scmp.ne.s32.totalorder %s4538_s10, %s4534_s9  ;;  %p5824_p1 = scmp.eq.s32.totalorder %s4606_s13, 0 }
   0x8   : > { %p90_p3 = scmp.eq.s32.totalorder %s3673_s14, 3  ;;  %p3674_p5 = scmp.ge.s32.totalorder %s4546_s12, 1 }
   0x9   : > { %p4615_p4 = por %p5824_p1, %p39_p0  ;;  %p97_p7 = scmp.lt.s32.totalorder %s4546_s12, 5 }
   0xa   : > { %p4620_p6 = por %p90_p3, %p39_p0  ;;  %s4548_s18 = smov [#allocation5]  }
   0xb   : > { %s5835_s15 = scalar_select %p4615_p4, 1, 0 }
   0xc   : > { %s5836_s16 = scalar_select %p4620_p6, 1, 0 }
   0xd   : > { %p4625_p8 = pnand %p3674_p5, %p97_p7  ;;  %s109_s19 = sshll.u32 %s4548_s18, 4  ;;  %s110_s19 = int_to_ptr.vmem [resolvable:$true] %s109_s19 }
   0xe   : > { %s4638_s21 = sadd.s32 1, %s4546_s12   ;;  %s26_s22 = sadd.s32 1, %s4542_s11 }
   0xf   : > { %s5837_s17 = scalar_select %p4625_p8, 1, 0 }
  0x10   : > { %p4303_p9 = pneg %p4625_p8  ;;  %s23_s23 = ssub.s32 %s4546_s12, %s4638_s21 }
  0x11   : > { %s4418_s26 = scalar_lea.hbm %s5822_s1, 640 }
  0x12   : > { %p4633_p10 = pnand %p4303_p9, %p5824_p1  ;;  %p4419_p11 = scmp.ne.s32.totalorder %s5822_s1, %s4418_s26 }
  0x13   : > { %p4425_p3 = scmp.lt.u32.totalorder %s4418_s26, %s5822_s1 }
  0x14   : > { %p4420_p12 = pneg %p4633_p10 }
  0x16   : > { %p4421_p13 = pnand %p4420_p12, %p4419_p11 }
  0x18   : > { %p4422_p0 = pneg %p4421_p13 }
  0x1a   : > { %p4427_p5 = pnand %p4425_p3, %p4422_p0 }
  0x1c   : > { %4430 = shalt.err (!%p4427_p5)
}
  0x1d   : > { %s4431_s3 = scalar_lea.vmem %s110_s19, 640  ;;  %p4439_p2 = scmp.lt.s32.totalorder %s110_s19, %s110_s19 }
  0x1e   : > { %p4432_p7 = scmp.ne.s32.totalorder %s110_s19, %s4431_s3  ;;  %p4440_p6 = scmp.lt.s32.totalorder %s4431_s3, %s4431_s3 }
  0x20   : > { %p4434_p9 = pnand %p4432_p7, %p4420_p12  ;;  %p4441_p4 = por %p4440_p6, %p4439_p2 }
  0x22   : > { %p4435_p1 = pneg %p4434_p9 }
  0x24   : > { %p4442_p8 = pnand %p4441_p4, %p4435_p1 }
  0x26   : > { %4445 = shalt.err (!%p4442_p8)
}
  0x27   : > { %s4549_s4 = smov 128   ;;  %s4550_s5 = smov 8  }
  0x28   : > { %4306 = dma.hbm_to_vmem [thread:$0]  (!%p4633_p10), %s5822_s1, 640, %s110_s19, [#allocation6], %s4549_s4, %s4549_s4, %s4550_s5  }
  0x29   : > { %p24_p11 = scmp.eq.s32.totalorder %s23_s23, 0  ;;  %p33_p2 = scmp.ne.s32.totalorder %s4542_s11, %s4538_s10 }
  0x2a   : > { %p34_p1 = scmp.eq.s32.totalorder %s4546_s12, 0  ;;  %p4316_p4 = scmp.lt.s32.totalorder %s4546_s12, 4 }
  0x2b   : > { %s4664_s8 = scalar_select %p24_p11, %s4542_s11, %s26_s22  }
  0x2c   : > { %p35_p6 = por %p34_p1, %p33_p2  ;;  %p5839_p8 = scmp.eq.s32.totalorder %s4606_s13, 3 }
  0x2d   : > { %s123_s18 = sand.u32 1, %s4542_s11   ;;  %s3689_s24 = sshll.u32 %s4546_s12, 5 }
  0x2e   : > { %p4668_p12 = por %p5839_p8, %p33_p2  ;;  %s3677_s25 = sshll.u32 %s123_s18, 1 }
  0x2f   : > { %s4677_s27 = scalar_lea.hbm %s5821_s0, %s3689_s24  ;;  %s127_s19 = scalar_lea.vmem [#allocation2], %s3677_s25 }
  0x30   : > { %s135_s22 = sshll.u32 %s127_s19, 4  ;;  %p4679_p10 = pnand %p4316_p4, %p35_p6  ;;  %s4683_s22 = int_to_ptr.vmem [resolvable:$true] %s135_s22 }
  0x31   : > { %s124_s28 = scalar_lea.sflag [#allocation3], %s123_s18  ;;  %s4446_s29 = scalar_lea.hbm %s4677_s27, 32 }
  0x32   : > { %p4447_p13 = scmp.ne.s32.totalorder %s4677_s27, %s4446_s29  ;;  %p4448_p0 = pneg %p4679_p10 }
  0x33   : > { %s4451_s4 = scalar_lea.hbm %s5821_s0, 128  ;;  %p4452_p7 = scmp.lt.u32.totalorder %s4677_s27, %s5821_s0 }
  0x34   : > { %p4449_p3 = pnand %p4448_p0, %p4447_p13  ;;  %p4453_p9 = scmp.lt.u32.totalorder %s4451_s4, %s4446_s29 }
  0x35   : > { %p4455_p2 = scmp.lt.u32.totalorder %s4446_s29, %s4677_s27 }
  0x36   : > { %p4450_p5 = pneg %p4449_p3  ;;  %p4454_p11 = por %p4453_p9, %p4452_p7 }
  0x38   : > { %p4456_p1 = por %p4455_p2, %p4454_p11 }
  0x3a   : > { %p4457_p4 = pnand %p4456_p1, %p4450_p5 }
  0x3c   : > { %4460 = shalt.err (!%p4457_p4)
}
  0x3d   : > { %s4461_s7 = scalar_lea.vmem %s4683_s22, 32  ;;  %s4551_s18 = smov [#allocation2]  }
  0x3e   : > { %p4462_p6 = scmp.ne.s32.totalorder %s4683_s22, %s4461_s7  ;;  %s4466_s24 = sshll.u32 %s4551_s18, 4  ;;  %s4467_s24 = int_to_ptr.vmem [resolvable:$false] %s4466_s24 }
  0x3f   : > { %s4468_s25 = scalar_lea.vmem %s4467_s24, 64  ;;  %p4469_p3 = scmp.lt.s32.totalorder %s4683_s22, %s4467_s24 }
  0x40   : > { %p4464_p8 = pnand %p4462_p6, %p4448_p0  ;;  %p4470_p7 = scmp.lt.s32.totalorder %s4468_s25, %s4461_s7 }
  0x42   : > { %p4465_p13 = pneg %p4464_p8  ;;  %p4471_p9 = por %p4470_p7, %p4469_p3 }
  0x44   : > { %p4472_p11 = pnand %p4471_p9, %p4465_p13 }
  0x46   : > { %4475 = shalt.err (!%p4472_p11)
}
  0x47   : > { %4310 = dma.hbm_to_vmem [thread:$0]  (!%p4679_p10), %s4677_s27, 32, %s4683_s22, %s124_s28  }
  0x48   : > { %p5842_p5 = scmp.ne.s32.totalorder %s5837_s17, 0 }
  0x49   : > { %s4713_s20 = sand.u32 (!%p5842_p5), 1, %s4538_s10   ;;  %p5843_p0 = scmp.ne.s32.totalorder (!%p5842_p5), %s5835_s15, 0 }
  0x4a   : > { %144 = sbr.rel (%p5842_p5) target bundleno = 2648 (0xa58), region = 28  ;;  %s3681_s26 = sshll.u32 (!%p5842_p5), %s4713_s20, 1 }
  0x4b   : > { %s147_s19 = scalar_lea.sflag (!%p5842_p5), [#allocation3], %s4713_s20  ;;  %s150_s29 = scalar_lea.vmem (!%p5842_p5), [#allocation2], %s3681_s26 }
  0x51   : > { %4521 = dma.done.wait (%p5843_p0), %s147_s19, 32  }
  0x52   : > { %4523 = vsyncadd (%p5843_p0), %s147_s19, 4294967264  ;;  %p5844_p10 = scmp.eq.s32.totalorder %s4606_s13, 0 }
  0x54   : > { %4525 = dma.done.wait (%p5844_p10), [#allocation6], 640   ;;  %p5845_p2 = pmov %p5844_p10 }
  0x55   : > { %v5827_v0 = vlaneseq  ;;  %v5828_v1 = vmov 32   ;;  %v4737_v5 = vld [vmem:[%s150_s29] sm:$0x3]  ;;  %v176_v6 = vld [vmem:[#allocation5] sm:$0xff]  ;;  %vm204_vm0 = vcmask 1040384   ;;  %vm207_vm1 = vcmask 1041408  }
  0x56   : > { %4527 = vsyncadd (%p5845_p2), [#allocation6], 4294966656  ;;  %4372 = vset.pattern.permute.xlu1 %v5828_v1  ;;  %v181_v7 = vmul.f32 %v4737_v5, %v4737_v5  ;;  %v4553_v17 = vmov 33   ;;  %v177_v18 = vld [vmem:[#allocation5 + $0x8] sm:$0xff]  ;;  %v178_v19 = vld [vmem:[#allocation5 + $0x10] sm:$0xff]  ;;  %v4554_v20 = vmov 0  }
  0x57   : > { %v4729_v2 = vshrl.u32 %v5827_v0, 7  ;;  %241 = vperm.xlu1 %4372, %v176_v6   ;;  %4371 = vset.pattern.permute.xlu0 %v4554_v20  ;;  %v179_v21 = vld [vmem:[#allocation5 + $0x18] sm:$0xff]  ;;  %v4555_v22 = vmov 1.0|1.0   ;;  %v4556_v31 = vmov 0.0   ;;  %s4557_s15 = smov 34  }
  0x58   : > { %4027 = vmatprep.subr.bf16.mxu0 %v4555_v22  ;;  %503 = vmatprep.subr.mxu1 %v4556_v31  ;;  %s4558_s17 = smov 94   ;;  %s4560_s27 = smov 35   ;;  %vm1312_vm2 = vcmask 261120  }
  0x59   : > { %v4732_v3 = vsub.s32 0, %v4729_v2  ;;  %v4735_v4 = vsub.s32 1, %v4729_v2  ;;  %4028 = vmatpush3.bf16.msra.mxu0 %v4555_v22  ;;  %504 = vmatpush1.msra.mxu1 %v4556_v31  ;;  %s4563_s22 = smov 37   ;;  %s4565_s23 = smov 91  }
  0x5a   : > { %4029 = vmatprep.subr.bf16.mxu0 %v4555_v22  ;;  %624 = vmatprep.subr.mxu1 %v4556_v31  ;;  %s4566_s28 = smov 38   ;;  %s3690_s30 = sshll.u32 %s4606_s13, 5 }
  0x5b   : > { %v186_v8 = vrot.slane %v4737_v5, %v4732_v3  ;;  %v190_v9 = vrot.slane %v4737_v5, %v4735_v4  ;;  %v197_v10 = vrot.slane %v181_v7, %v4732_v3  ;;  %v201_v11 = vrot.slane %v181_v7, %v4735_v4  ;;  %4373 = vset.pattern.permute.xlu1 %v4553_v17  ;;  %s174_s3 = scalar_lea.vmem [#allocation7], %s3681_s26  ;;  %s5778_s7 = scalar_lea.hbm %s5823_s2, %s3690_s30 }
  0x5c   : > { %279 = vperm.xlu1 %4373, %v176_v6   ;;  %s3593_s4 = sshll.u32 %s174_s3, 4  ;;  %s3579_s18 = scalar_lea.sflag [#allocation4], %s4713_s20  ;;  %s5780_s4 = int_to_ptr.vmem [resolvable:$true] %s3593_s4 }
  0x5d   : > { %v205_v12 = vsel %vm204_vm0, %v186_v8, %v197_v10  ;;  %v206_v13 = vsel %vm204_vm0, %v190_v9, %v201_v11  ;;  %4030 = vmatpush3.bf16.msra.mxu0 %v4555_v22  ;;  %s4476_s13 = scalar_lea.vmem %s5780_s4, 32  ;;  %s4569_s24 = smov [#allocation7]  }
  0x5e   : > { %v208_v14 = vsel %vm207_vm1, %v205_v12, 0.0  ;;  %v209_v15 = vsel %vm207_vm1, %v206_v13, 0.0  ;;  %4031 = vmatprep.subr.bf16.mxu0 %v4555_v22  ;;  %p4477_p1 = scmp.ne.s32.totalorder %s5780_s4, %s4476_s13  ;;  %s4480_s25 = sshll.u32 %s4569_s24, 4  ;;  %s4481_s25 = int_to_ptr.vmem [resolvable:$false] %s4480_s25 }
  0x5f   : > { %v210_v16 = vadd.f32 %v209_v15, %v208_v14  ;;  %s4482_s26 = scalar_lea.vmem %s4481_s25, 64  ;;  %p4483_p8 = scmp.lt.s32.totalorder %s5780_s4, %s4481_s25 }
  0x60   : > { %4374 = vset.pattern.permute.xlu1 %v5828_v1  ;;  %p4478_p4 = pnand %p4477_p1, %p4668_p12  ;;  %p4484_p13 = scmp.lt.s32.totalorder %s4482_s26, %s4476_s13 }
  0x61   : > { %211 = vadd.xlane.f32.xlu0 %v210_v16  ;;  %246 = vperm.xlu1 %4374, %v177_v18  }
  0x62   : > { %4032 = vmatpush3.bf16.msra.mxu0 %v4555_v22  ;;  %p4479_p6 = pneg %p4478_p4  ;;  %p4485_p3 = por %p4484_p13, %p4483_p8 }
  0x63   : > { %4033 = vmatprep.subr.bf16.mxu0 %v4555_v22 }
  0x64   : > { %p4486_p7 = pnand %p4485_p3, %p4479_p6 }
  0x65   : > { %4375 = vset.pattern.permute.xlu1 %v4553_v17 }
  0x66   : > { %283 = vperm.xlu1 %4375, %v177_v18   ;;  %4034 = vmatpush3.bf16.msra.mxu0 %v4555_v22 }
  0x67   : > { %4035 = vmatprep.subr.bf16.mxu0 %v4555_v22 }
  0x6a   : > { %4376 = vset.pattern.permute.xlu1 %v5828_v1  ;;  %4036 = vmatpush3.bf16.msra.mxu0 %v4555_v22 }
  0x6b   : > { %251 = vperm.xlu1 %4376, %v178_v19   ;;  %4037 = vmatprep.subr.bf16.mxu0 %v4555_v22 }
  0x6e   : > { %4038 = vmatpush3.bf16.msra.mxu0 %v4555_v22 }
  0x6f   : > { %4377 = vset.pattern.permute.xlu1 %v4553_v17  ;;  %4039 = vmatprep.subr.bf16.mxu0 %v4555_v22 }
  0x70   : > { %287 = vperm.xlu1 %4377, %v178_v19  }
  0x72   : > { %4040 = vmatpush3.bf16.msra.mxu0 %v4555_v22 }
  0x73   : > { %4041 = vmatprep.subr.bf16.mxu0 %v4555_v22 }
  0x74   : > { %4378 = vset.pattern.permute.xlu1 %v5828_v1 }
  0x75   : > { %256 = vperm.xlu1 %4378, %v179_v21  }
  0x76   : > { %4042 = vmatpush3.bf16.msra.mxu0 %v4555_v22 }
  0x77   : > { %4043 = vmatprep.subr.bf16.mxu0 %v4555_v22 }
  0x79   : > { %4379 = vset.pattern.permute.xlu1 %v4553_v17 }
  0x7a   : > { %291 = vperm.xlu1 %4379, %v179_v21  }
  0xd6   : > { %v242_v32 = vpop.permute.xlu1 %241 }
  0xdb   : > { %v280_v33 = vpop.permute.xlu1 %279 }
  0xe0   : > { %v247_v34 = vpop.permute.xlu1 %246 }
  0xe5   : > { %v284_v35 = vpop.permute.xlu1 %283 }
  0xea   : > { %v252_v36 = vpop.permute.xlu1 %251 }
  0xee   : > { %v212_v23 = vpop.xlane.xlu0 %211 }
  0xef   : > { %v213_v24 = vmul.f32 0.00390625, %v212_v23  ;;  %v288_v37 = vpop.permute.xlu1 %287 }
  0xf1   : > { %v214_v25 = vmul.f32 %v213_v24, %v213_v24  ;;  %v226_v38 = vrot.slane %v213_v24, %v4732_v3 }
  0xf3   : > { %v216_v26 = vrot.slane %v214_v25, 7  ;;  %v228_v40 = vsub.f32 %v4737_v5, %v226_v38 }
  0xf4   : > { %v257_v42 = vpop.permute.xlu1 %256 }
  0xf5   : > { %v218_v27 = vsub.f32 %v213_v24, %v216_v26 }
  0xf7   : > { %v219_v28 = vmax.f32 %v218_v27, 0.0 }
  0xf9   : > { %v220_v29 = vadd.f32 1e-05, %v219_v28  ;;  %v292_v50 = vpop.permute.xlu1 %291 }
  0xfb   : > { %4392 = vrsqrt.f32 %v220_v29 }
 0x105   : > { %v4393_v30 = vpop.eup %4392 }
 0x106   : > { %231 = vperm.xlu0 %4371, %v4393_v30  }
 0x185   : > { %v232_v39 = vpop.permute.xlu0 %231 }
 0x186   : > { %v236_v41 = vrot.slane %v232_v39, %v4735_v4 }
 0x188   : > { %v238_v43 = vmul.f32 %v236_v41, %v228_v40 }
 0x18a   : > { %v263_v44 = vrot.slane %v238_v43, %v4732_v3  ;;  %v267_v45 = vrot.slane %v238_v43, %v4735_v4 }
 0x18c   : > { %v270_v46 = vmul.f32 %v263_v44, %v242_v32  ;;  %v271_v47 = vmul.f32 %v267_v45, %v242_v32  ;;  %v272_v48 = vmul.f32 %v263_v44, %v247_v34  ;;  %v273_v49 = vmul.f32 %v267_v45, %v247_v34 }
 0x18d   : > { %v274_v51 = vmul.f32 %v263_v44, %v252_v36  ;;  %v275_v52 = vmul.f32 %v267_v45, %v252_v36  ;;  %v276_v53 = vmul.f32 %v263_v44, %v257_v42  ;;  %v277_v54 = vmul.f32 %v267_v45, %v257_v42 }
 0x18e   : > { %v294_v55 = vadd.f32 %v280_v33, %v270_v46  ;;  %v295_v56 = vadd.f32 %v280_v33, %v271_v47  ;;  %v296_v57 = vadd.f32 %v284_v35, %v272_v48  ;;  %v297_v58 = vadd.f32 %v284_v35, %v273_v49 }
 0x18f   : > { %v298_v59 = vadd.f32 %v288_v37, %v274_v51  ;;  %v299_v60 = vadd.f32 %v288_v37, %v275_v52  ;;  %v300_v61 = vadd.f32 %v292_v50, %v276_v53  ;;  %v301_v62 = vadd.f32 %v292_v50, %v277_v54 }
 0x190   : > { %v4775_v63 = vmax.f32 %v294_v55, 0.0  ;;  %v4777_v3 = vmax.f32 %v295_v56, 0.0  ;;  %v4779_v4 = vmax.f32 %v296_v57, 0.0  ;;  %v4781_v5 = vmax.f32 %v297_v58, 0.0 }
 0x191   : > { %v4783_v6 = vmax.f32 %v298_v59, 0.0  ;;  %v4785_v7 = vmax.f32 %v299_v60, 0.0  ;;  %v4787_v8 = vmax.f32 %v301_v62, 0.0  ;;  %v4801_v13 = vmax.f32 %v300_v61, 0.0 }
 0x192   : > { %v4790_v9 = vand.u32 4294901760, %v4777_v3  ;;  %v4793_v10 = vand.u32 4294901760, %v4775_v63  ;;  %v4796_v11 = vand.u32 4294901760, %v4781_v5  ;;  %v4799_v12 = vand.u32 4294901760, %v4779_v4 }
 0x193   : > { %v4804_v14 = vand.u32 4294901760, %v4785_v7  ;;  %v4807_v15 = vand.u32 4294901760, %v4783_v6  ;;  %v4810_v16 = vand.u32 4294901760, %v4787_v8  ;;  %v311_v23 = vmul.f32 %v4777_v3, %v4777_v3 }
 0x194   : > { %568 = vmatprep.mubr.f32.mxu1 %v4790_v9  ;;  %v4815_v17 = vsub.f32 %v4777_v3, %v4790_v9  ;;  %v4819_v18 = vsub.f32 %v4775_v63, %v4793_v10  ;;  %v4823_v19 = vsub.f32 %v4781_v5, %v4796_v11  ;;  %v4827_v20 = vsub.f32 %v4779_v4, %v4799_v12 }
 0x195   : > { %570 = vmatmul.mubr.f32.vlgmr.msra.gmra.mrb[0].mxu1 %v4793_v10  ;;  %v4832_v21 = vsub.f32 %v4785_v7, %v4804_v14  ;;  %v4838_v24 = vsub.f32 %v4783_v6, %v4807_v15  ;;  %v310_v25 = vmul.f32 %v4775_v63, %v4775_v63  ;;  %v4849_v30 = vand.u32 4294901760, %v4801_v13 }
 0x196   : > { %575 = vmatprep.mubr.f32.mxu1 %v4796_v11  ;;  %v384_v26 = vand.u32 4294901760, %v4815_v17  ;;  %v390_v27 = vand.u32 4294901760, %v4819_v18  ;;  %v399_v28 = vand.u32 4294901760, %v4823_v19  ;;  %v405_v29 = vand.u32 4294901760, %v4827_v20  ;;  %625 = vmatpush1.msra.mxu1 %v4556_v31 }
 0x197   : > { %v414_v32 = vand.u32 4294901760, %v4832_v21  ;;  %914 = vmatprep.subr.mxu1 %v4556_v31  ;;  %v4862_v36 = vand.u32 4294901760, %v311_v23  ;;  %v420_v37 = vand.u32 4294901760, %v4838_v24  ;;  %v4868_v38 = vsub.f32 %v4787_v8, %v4810_v16 }
 0x198   : > { %v385_v33 = vsub.f32 %v4815_v17, %v384_v26  ;;  %v391_v34 = vsub.f32 %v4819_v18, %v390_v27  ;;  %v400_v35 = vsub.f32 %v4823_v19, %v399_v28  ;;  %v313_v39 = vmul.f32 %v4781_v5, %v4781_v5 }
 0x199   : > { %577 = vmatmul.mubr.f32.gmra.mrb[2].mxu1 %v4799_v12  ;;  %v406_v42 = vsub.f32 %v4827_v20, %v405_v29  ;;  %v4876_v43 = vand.u32 4294901760, %v310_v25  ;;  %v415_v45 = vsub.f32 %v4832_v21, %v414_v32  ;;  %v429_v46 = vand.u32 4294901760, %v4868_v38 }
 0x19a   : > { %582 = vmatprep.mubr.f32.mxu1 %v4804_v14  ;;  %v386_v40 = vand.u32 4294901760, %v385_v33  ;;  %v392_v41 = vand.u32 4294901760, %v391_v34  ;;  %v401_v44 = vand.u32 4294901760, %v400_v35  ;;  %v4882_v47 = vand.u32 4294901760, %v313_v39 }
 0x19b   : > { %v4886_v48 = vsub.f32 %v4801_v13, %v4849_v30  ;;  %v312_v49 = vmul.f32 %v4779_v4, %v4779_v4  ;;  %v4891_v50 = vsub.f32 %v311_v23, %v4862_v36  ;;  %v315_v51 = vmul.f32 %v4785_v7, %v4785_v7 }
 0x19c   : > { %387 = vmatprep.mubr.f32.mxu0 %v386_v40  ;;  %v407_v52 = vand.u32 4294901760, %v406_v42  ;;  %v421_v53 = vsub.f32 %v4838_v24, %v420_v37  ;;  %v430_v54 = vsub.f32 %v4868_v38, %v429_v46  ;;  %v4904_v55 = vsub.f32 %v310_v25, %v4876_v43 }
 0x19d   : > { %393 = vmatmul.mubr.f32.vlgmr.msra.gmra.mrb[0].mxu0 %v392_v41  ;;  %584 = vmatmul.mubr.f32.gmra.mrb[4].mxu1 %v4807_v15  ;;  %v416_v56 = vand.u32 4294901760, %v415_v45  ;;  %v435_v57 = vand.u32 4294901760, %v4886_v48  ;;  %v4908_v58 = vand.u32 4294901760, %v312_v49  ;;  %v314_v59 = vmul.f32 %v4783_v6, %v4783_v6 }
 0x19e   : > { %402 = vmatprep.mubr.f32.mxu0 %v401_v44  ;;  %589 = vmatprep.mubr.f32.mxu1 %v4810_v16  ;;  %v444_v60 = vand.u32 4294901760, %v4891_v50  ;;  %v4914_v61 = vand.u32 4294901760, %v315_v51  ;;  %v4917_v62 = vsub.f32 %v313_v39, %v4882_v47  ;;  %v317_v23 = vmul.f32 %v4787_v8, %v4787_v8 }
 0x19f   : > { %4044 = vmatpush3.bf16.msra.mxu0 %v4555_v22  ;;  %v422_v25 = vand.u32 4294901760, %v421_v53  ;;  %v431_v33 = vand.u32 4294901760, %v430_v54  ;;  %v450_v34 = vand.u32 4294901760, %v4904_v55  ;;  %v436_v35 = vsub.f32 %v4886_v48, %v435_v57 }
 0x1a0   : > { %4045 = vmatprep.subr.bf16.mxu0 %v4555_v22  ;;  %v4928_v39 = vand.u32 4294901760, %v314_v59  ;;  %v4931_v40 = vsub.f32 %v312_v49, %v4908_v58  ;;  %v316_v41 = vmul.f32 %v4801_v13, %v4801_v13  ;;  %v445_v42 = vsub.f32 %v4891_v50, %v444_v60 }
 0x1a1   : > { %408 = vmatmul.mubr.f32.gmra.mrb[2].mxu0 %v407_v52  ;;  %591 = vmatmul.mubr.f32.gmra.mrb[6].mxu1 %v4849_v30  ;;  %v5830_v44 = vand.u32 4294901760, %v4917_v62  ;;  %v4940_v45 = vand.u32 4294901760, %v317_v23  ;;  %v4943_v52 = vsub.f32 %v315_v51, %v4914_v61  ;;  %v451_v49 = vsub.f32 %v4904_v55, %v450_v34 }
 0x1a2   : > { %417 = vmatprep.mubr.f32.mxu0 %v416_v56  ;;  %596 = vmatprep.mubr.f32.mxu1 %v4862_v36  ;;  %v437_v53 = vand.u32 4294901760, %v436_v35  ;;  %v465_v54 = vand.u32 4294901760, %v4931_v40  ;;  %v4952_v56 = vand.u32 4294901760, %v316_v41  ;;  %v4955_v51 = vsub.f32 %v314_v59, %v4928_v39 }
 0x1a3   : > { %4046 = vmatpush3.bf16.msra.mxu0 %v4555_v22  ;;  %v5831_v0 = vand.u32 4294901760, %v4943_v52  ;;  %v4963_v1 = vsub.f32 %v317_v23, %v4940_v45  ;;  %v452_v59 = vand.u32 4294901760, %v451_v49 }
 0x1a4   : > { %4047 = vmatprep.subr.bf16.mxu0 %v4555_v22  ;;  %v466_v35 = vsub.f32 %v4931_v40, %v465_v54 }
 0x1a5   : > { %423 = vmatmul.mubr.f32.gmra.mrb[4].mxu0 %v422_v25  ;;  %598 = vmatmul.mubr.f32.gmra.mrb[8].mxu1 %v4876_v43  ;;  %v446_v25 = vand.u32 4294901760, %v445_v42  ;;  %v480_v42 = vand.u32 4294901760, %v4955_v51 }
 0x1a6   : > { %432 = vmatprep.mubr.f32.mxu0 %v431_v33  ;;  %603 = vmatprep.mubr.f32.mxu1 %v4882_v47  ;;  %v460_v33 = vsub.f32 %v4917_v62, %v5830_v44  ;;  %v4973_v44 = vsub.f32 %v316_v41, %v4952_v56  ;;  %v467_v49 = vand.u32 4294901760, %v466_v35 }
 0x1a7   : > { %4048 = vmatpush3.bf16.msra.mxu0 %v4555_v22  ;;  %v481_v41 = vsub.f32 %v4955_v51, %v480_v42 }
 0x1a8   : > { %4049 = vmatprep.subr.bf16.mxu0 %v4555_v22  ;;  %v461_v23 = vand.u32 4294901760, %v460_v33  ;;  %v495_v33 = vand.u32 4294901760, %v4973_v44 }
 0x1a9   : > { %438 = vmatmul.mubr.f32.gmra.mrb[6].mxu0 %v437_v53  ;;  %605 = vmatmul.mubr.f32.gmra.mrb[10].mxu1 %v4908_v58  ;;  %v475_v53 = vsub.f32 %v4943_v52, %v5831_v0  ;;  %v482_v35 = vand.u32 4294901760, %v481_v41 }
 0x1aa   : > { %447 = vmatprep.mubr.f32.mxu0 %v446_v25  ;;  %610 = vmatprep.mubr.f32.mxu1 %v4914_v61  ;;  %v489_v25 = vand.u32 4294901760, %v4963_v1 }
 0x1ab   : > { %4050 = vmatpush3.bf16.msra.mxu0 %v4555_v22  ;;  %v476_v0 = vand.u32 4294901760, %v475_v53 }
 0x1ac   : > { %4051 = vmatprep.subr.bf16.mxu0 %v4555_v22 }
 0x1ad   : > { %453 = vmatmul.mubr.f32.gmra.mrb[8].mxu0 %v452_v59  ;;  %612 = vmatmul.mubr.f32.gmra.mrb[12].mxu1 %v4928_v39  ;;  %v490_v59 = vsub.f32 %v4963_v1, %v489_v25 }
 0x1ae   : > { %462 = vmatprep.mubr.f32.mxu0 %v461_v23  ;;  %617 = vmatprep.mubr.f32.mxu1 %v4940_v45  ;;  %v496_v23 = vsub.f32 %v4973_v44, %v495_v33 }
 0x1af   : > { %4052 = vmatpush3.bf16.msra.mxu0 %v4555_v22  ;;  %v491_v53 = vand.u32 4294901760, %v490_v59 }
 0x1b0   : > { %4053 = vmatprep.subr.bf16.mxu0 %v4555_v22 }
 0x1b1   : > { %468 = vmatmul.mubr.f32.gmra.mrb[10].mxu0 %v467_v49  ;;  %619 = vmatmul.mubr.f32.gmra.mrb[14].mxu1 %v4952_v56 }
 0x1b2   : > { %477 = vmatprep.mubr.f32.mxu0 %v476_v0  ;;  %690 = vmatprep.mubr.f32.mxu1 %v4815_v17  ;;  %v497_v0 = vand.u32 4294901760, %v496_v23  ;;  %v5846_v17 = vand.u32 4294901760, %v4917_v62 }
 0x1b3   : > { %4054 = vmatpush3.bf16.msra.mxu0 %v4555_v22 }
 0x1b4   : > { %4055 = vmatprep.subr.bf16.mxu0 %v4555_v22 }
 0x1b5   : > { %483 = vmatmul.mubr.f32.gmra.mrb[12].mxu0 %v482_v35  ;;  %693 = vmatmul.mubr.f32.vlgmr.msra.gmra.mrb[16].mxu1 %v4819_v18  ;;  %v5847_v18 = vand.u32 4294901760, %v4943_v52 }
 0x1b6   : > { %492 = vmatprep.mubr.f32.mxu0 %v491_v53  ;;  %699 = vmatprep.mubr.f32.mxu1 %v4823_v19 }
 0x1b7   : > { %4056 = vmatpush3.bf16.msra.mxu0 %v4555_v22  ;;  %915 = vmatpush1.msra.mxu1 %v4556_v31 }
 0x1b8   : > { %4057 = vmatprep.subr.bf16.mxu0 %v4555_v22 }
 0x1b9   : > { %498 = vmatmul.mubr.f32.gmra.mrb[14].mxu0 %v497_v0  ;;  %702 = vmatmul.mubr.f32.gmra.mrb[18].mxu1 %v4827_v20 }
 0x1ba   : > { %708 = vmatprep.mubr.f32.mxu1 %v4832_v21  ;;  %828 = vmatprep.mubr.f32.mxu0 %v384_v26 }
 0x1bb   : > { %4058 = vmatpush3.bf16.msra.mxu0 %v4555_v22 }
 0x1bc   : > { %4059 = vmatprep.subr.bf16.mxu0 %v4555_v22 }
 0x1bd   : > { %711 = vmatmul.mubr.f32.gmra.mrb[20].mxu1 %v4838_v24 }
 0x1be   : > { %832 = vmatmul.mubr.f32.vlgmr.msra.gmra.mrb[16].mxu0 %v390_v27  ;;  %717 = vmatprep.mubr.f32.mxu1 %v4868_v38 }
 0x1bf   : > { %839 = vmatprep.mubr.f32.mxu0 %v399_v28  ;;  %4060 = vmatpush3.bf16.msra.mxu0 %v4555_v22 }
 0x1c0   : > { %4061 = vmatprep.subr.bf16.mxu0 %v4555_v22 }
 0x1c1   : > { %720 = vmatmul.mubr.f32.gmra.mrb[22].mxu1 %v4886_v48 }
 0x1c2   : > { %843 = vmatmul.mubr.f32.gmra.mrb[18].mxu0 %v405_v29  ;;  %726 = vmatprep.mubr.f32.mxu1 %v4891_v50 }
 0x1c3   : > { %850 = vmatprep.mubr.f32.mxu0 %v414_v32  ;;  %4062 = vmatpush3.bf16.msra.mxu0 %v4555_v22 }
 0x1c4   : > { %4063 = vmatprep.subr.bf16.mxu0 %v4555_v22 }
 0x1c5   : > { %729 = vmatmul.mubr.f32.gmra.mrb[24].mxu1 %v4904_v55 }
 0x1c6   : > { %854 = vmatmul.mubr.f32.gmra.mrb[20].mxu0 %v420_v37  ;;  %735 = vmatprep.mubr.f32.mxu1 %v4917_v62 }
 0x1c7   : > { %861 = vmatprep.mubr.f32.mxu0 %v429_v46  ;;  %4064 = vmatpush3.bf16.msra.mxu0 %v4555_v22 }
 0x1c8   : > { %4065 = vmatprep.subr.bf16.mxu0 %v4555_v22 }
 0x1c9   : > { %738 = vmatmul.mubr.f32.gmra.mrb[26].mxu1 %v4931_v40 }
 0x1ca   : > { %865 = vmatmul.mubr.f32.gmra.mrb[22].mxu0 %v435_v57  ;;  %744 = vmatprep.mubr.f32.mxu1 %v4943_v52 }
 0x1cb   : > { %872 = vmatprep.mubr.f32.mxu0 %v444_v60  ;;  %4066 = vmatpush3.bf16.msra.mxu0 %v4555_v22 }
 0x1cc   : > { %4067 = vmatprep.subr.bf16.mxu0 %v4555_v22 }
 0x1cd   : > { %747 = vmatmul.mubr.f32.gmra.mrb[28].mxu1 %v4955_v51 }
 0x1ce   : > { %876 = vmatmul.mubr.f32.gmra.mrb[24].mxu0 %v450_v34  ;;  %753 = vmatprep.mubr.f32.mxu1 %v4963_v1 }
 0x1cf   : > { %883 = vmatprep.mubr.f32.mxu0 %v5846_v17  ;;  %4068 = vmatpush3.bf16.msra.mxu0 %v4555_v22 }
 0x1d0   : > { %4069 = vmatprep.subr.bf16.mxu0 %v4555_v22 }
 0x1d1   : > { %756 = vmatmul.mubr.f32.gmra.mrb[30].mxu1 %v4973_v44 }
 0x1d2   : > { %887 = vmatmul.mubr.f32.gmra.mrb[26].mxu0 %v465_v54  ;;  %979 = vmatprep.mubr.f32.mxu1 %v4790_v9 }
 0x1d3   : > { %894 = vmatprep.mubr.f32.mxu0 %v5847_v18  ;;  %4070 = vmatpush3.bf16.msra.mxu0 %v4555_v22 }
 0x1d4   : > { %4071 = vmatprep.subr.bf16.mxu0 %v4555_v22 }
 0x1d5   : > { %981 = vmatmul.mubr.f32.vlgmr.msra.gmra.mrb[32].mxu1 %v4793_v10 }
 0x1d6   : > { %898 = vmatmul.mubr.f32.gmra.mrb[28].mxu0 %v480_v42  ;;  %986 = vmatprep.mubr.f32.mxu1 %v4796_v11 }
 0x1d7   : > { %905 = vmatprep.mubr.f32.mxu0 %v489_v25  ;;  %4072 = vmatpush3.bf16.msra.mxu0 %v4555_v22 }
 0x1d8   : > { %4073 = vmatprep.subr.bf16.mxu0 %v4555_v22 }
 0x1d9   : > { %988 = vmatmul.mubr.f32.gmra.mrb[34].mxu1 %v4799_v12 }
 0x1da   : > { %909 = vmatmul.mubr.f32.gmra.mrb[30].mxu0 %v495_v33  ;;  %993 = vmatprep.mubr.f32.mxu1 %v4804_v14 }
 0x1db   : > { %4074 = vmatpush3.bf16.msra.mxu0 %v4555_v22  ;;  %1100 = vmatprep.mubr.f32.mxu0 %v4790_v9 }
 0x1dc   : > { %4123 = vmatprep.subr.bf16.mxu0 %v4555_v22 }
 0x1dd   : > { %995 = vmatmul.mubr.f32.gmra.mrb[36].mxu1 %v4807_v15 }
 0x1de   : > { %1102 = vmatmul.mubr.f32.vlgmr.msra.gmra.mrb[32].mxu0 %v4793_v10  ;;  %1000 = vmatprep.mubr.f32.mxu1 %v4810_v16 }
 0x1df   : > { %1107 = vmatprep.mubr.f32.mxu0 %v4796_v11  ;;  %4124 = vmatpush3.bf16.msra.mxu0 %v4555_v22 }
 0x1e0   : > { %4125 = vmatprep.subr.bf16.mxu0 %v4555_v22 }
 0x1e1   : > { %1002 = vmatmul.mubr.f32.gmra.mrb[38].mxu1 %v4849_v30 }
 0x1e2   : > { %1109 = vmatmul.mubr.f32.gmra.mrb[34].mxu0 %v4799_v12  ;;  %1007 = vmatprep.mubr.f32.mxu1 %v4862_v36 }
 0x1e3   : > { %1114 = vmatprep.mubr.f32.mxu0 %v4804_v14  ;;  %4126 = vmatpush3.bf16.msra.mxu0 %v4555_v22 }
 0x1e4   : > { %4127 = vmatprep.subr.bf16.mxu0 %v4555_v22 }
 0x1e5   : > { %1009 = vmatmul.mubr.f32.gmra.mrb[40].mxu1 %v4876_v43 }
 0x1e6   : > { %1116 = vmatmul.mubr.f32.gmra.mrb[36].mxu0 %v4807_v15  ;;  %1014 = vmatprep.mubr.f32.mxu1 %v4882_v47 }
 0x1e7   : > { %1121 = vmatprep.mubr.f32.mxu0 %v4810_v16  ;;  %4128 = vmatpush3.bf16.msra.mxu0 %v4555_v22 }
 0x1e8   : > { %4129 = vmatprep.subr.bf16.mxu0 %v4555_v22 }
 0x1e9   : > { %1016 = vmatmul.mubr.f32.gmra.mrb[42].mxu1 %v4908_v58 }
 0x1ea   : > { %1123 = vmatmul.mubr.f32.gmra.mrb[38].mxu0 %v4849_v30  ;;  %1021 = vmatprep.mubr.f32.mxu1 %v4914_v61 }
 0x1eb   : > { %1128 = vmatprep.mubr.f32.mxu0 %v4862_v36  ;;  %4130 = vmatpush3.bf16.msra.mxu0 %v4555_v22 }
 0x1ec   : > { %4131 = vmatprep.subr.bf16.mxu0 %v4555_v22 }
 0x1ed   : > { %1023 = vmatmul.mubr.f32.gmra.mrb[44].mxu1 %v4928_v39 }
 0x1ee   : > { %1130 = vmatmul.mubr.f32.gmra.mrb[40].mxu0 %v4876_v43  ;;  %1028 = vmatprep.mubr.f32.mxu1 %v4940_v45 }
 0x1ef   : > { %1135 = vmatprep.mubr.f32.mxu0 %v4882_v47  ;;  %4132 = vmatpush3.bf16.msra.mxu0 %v4555_v22 }
 0x1f0   : > { %4133 = vmatprep.subr.bf16.mxu0 %v4555_v22 }
 0x1f1   : > { %1030 = vmatmul.mubr.f32.gmra.mrb[46].mxu1 %v4952_v56 }
 0x1f2   : > { %1137 = vmatmul.mubr.f32.gmra.mrb[42].mxu0 %v4908_v58  ;;  %1393 = vmatprep.mubr.f32.mxu1 %v4556_v31 }
 0x1f3   : > { %1142 = vmatprep.mubr.f32.mxu0 %v4914_v61  ;;  %4134 = vmatpush3.bf16.msra.mxu0 %v4555_v22 }
 0x1f4   : > { %4135 = vmatprep.subr.bf16.mxu0 %v4555_v22 }
 0x1f6   : > { %1144 = vmatmul.mubr.f32.gmra.mrb[44].mxu0 %v4928_v39 }
 0x1f7   : > { %1149 = vmatprep.mubr.f32.mxu0 %v4940_v45  ;;  %4136 = vmatpush3.bf16.msra.mxu0 %v4555_v22 }
 0x1f8   : > { %4137 = vmatprep.subr.bf16.mxu0 %v4555_v22 }
 0x1fa   : > { %1151 = vmatmul.mubr.f32.gmra.mrb[46].mxu0 %v4952_v56 }
 0x1fb   : > { %4138 = vmatpush3.bf16.msra.mxu0 %v4555_v22 }
 0x1fc   : > { %2333 = vmatprep.subr.mxu0 %v4556_v31 }
 0x268   : > { %v571_v1 = vpop.f32.mrb[0].mxu1 }
 0x269   : > { %v573_v9 = vpop.f32.mrb[1].mxu1 }
 0x26c   : > { %v578_v10 = vpop.f32.mrb[2].mxu1 }
 0x26d   : > { %v580_v11 = vpop.f32.mrb[3].mxu1 }
 0x270   : > { %v3723_v12 = vpop.f32.mrb[0].mxu0  ;;  %v585_v14 = vpop.f32.mrb[4].mxu1 }
 0x271   : > { %v3724_v15 = vpop.f32.mrb[1].mxu0  ;;  %v587_v16 = vpop.f32.mrb[5].mxu1 }
 0x272   : > { %v3725_v19 = vadd.f32 %v3724_v15, %v3723_v12 }
 0x274   : > { %v3726_v20 = vpop.f32.mrb[2].mxu0  ;;  %v592_v21 = vpop.f32.mrb[6].mxu1  ;;  %v572_v24 = vadd.f32 %v3725_v19, %v571_v1 }
 0x275   : > { %v3727_v26 = vpop.f32.mrb[3].mxu0  ;;  %v594_v27 = vpop.f32.mrb[7].mxu1 }
 0x276   : > { %v3728_v28 = vadd.f32 %v3727_v26, %v3726_v20 }
 0x278   : > { %v3729_v29 = vpop.f32.mrb[4].mxu0  ;;  %v599_v30 = vpop.f32.mrb[8].mxu1  ;;  %v579_v32 = vadd.f32 %v3728_v28, %v578_v10 }
 0x279   : > { %v3730_v36 = vpop.f32.mrb[5].mxu0  ;;  %v601_v37 = vpop.f32.mrb[9].mxu1 }
 0x27a   : > { %v3731_v38 = vadd.f32 %v3730_v36, %v3729_v29 }
 0x27c   : > { %v3732_v43 = vpop.f32.mrb[6].mxu0  ;;  %v606_v46 = vpop.f32.mrb[10].mxu1  ;;  %v586_v47 = vadd.f32 %v3731_v38, %v585_v14 }
 0x27d   : > { %v3733_v48 = vpop.f32.mrb[7].mxu0  ;;  %v608_v50 = vpop.f32.mrb[11].mxu1 }
 0x27e   : > { %v3734_v55 = vadd.f32 %v3733_v48, %v3732_v43 }
 0x280   : > { %v3735_v57 = vpop.f32.mrb[8].mxu0  ;;  %v613_v58 = vpop.f32.mrb[12].mxu1  ;;  %v593_v60 = vadd.f32 %v3734_v55, %v592_v21 }
 0x281   : > { %v3736_v61 = vpop.f32.mrb[9].mxu0  ;;  %v615_v62 = vpop.f32.mrb[13].mxu1 }
 0x282   : > { %v3737_v34 = vadd.f32 %v3736_v61, %v3735_v57 }
 0x284   : > { %v3738_v39 = vpop.f32.mrb[10].mxu0  ;;  %v620_v40 = vpop.f32.mrb[14].mxu1  ;;  %v600_v44 = vadd.f32 %v3737_v34, %v599_v30 }
 0x285   : > { %v3739_v45 = vpop.f32.mrb[11].mxu0  ;;  %v622_v52 = vpop.f32.mrb[15].mxu1 }
 0x286   : > { %v3740_v54 = vadd.f32 %v3739_v45, %v3738_v39 }
 0x288   : > { %v3741_v56 = vpop.f32.mrb[12].mxu0  ;;  %v694_v51 = vpop.f32.mrb[16].mxu1  ;;  %v607_v42 = vadd.f32 %v3740_v54, %v606_v46 }
 0x289   : > { %v695_v25 = vadd.f32 %v694_v51, %v572_v24  ;;  %v3742_v49 = vpop.f32.mrb[13].mxu0  ;;  %v696_v41 = vpop.f32.mrb[17].mxu1 }
 0x28a   : > { %v3743_v33 = vadd.f32 %v3742_v49, %v3741_v56 }
 0x28c   : > { %v3744_v59 = vpop.f32.mrb[14].mxu0  ;;  %v703_v35 = vpop.f32.mrb[18].mxu1  ;;  %v614_v23 = vadd.f32 %v3743_v33, %v613_v58 }
 0x28d   : > { %v704_v53 = vadd.f32 %v703_v35, %v579_v32  ;;  %v3745_v0 = vpop.f32.mrb[15].mxu0  ;;  %v705_v17 = vpop.f32.mrb[19].mxu1 }
 0x28e   : > { %v3746_v18 = vadd.f32 %v3745_v0, %v3744_v59 }
 0x290   : > { %v712_v1 = vpop.f32.mrb[20].mxu1  ;;  %v621_v9 = vadd.f32 %v3746_v18, %v620_v40 }
 0x291   : > { %v713_v10 = vadd.f32 %v712_v1, %v586_v47  ;;  %v3779_v11 = vpop.f32.mrb[16].mxu0  ;;  %v714_v12 = vpop.f32.mrb[21].mxu1 }
 0x292   : > { %v3780_v14 = vpop.f32.mrb[17].mxu0 }
 0x293   : > { %v3781_v15 = vadd.f32 %v3780_v14, %v3779_v11 }
 0x294   : > { %v721_v16 = vpop.f32.mrb[22].mxu1 }
 0x295   : > { %v722_v19 = vadd.f32 %v721_v16, %v593_v60  ;;  %v3782_v20 = vpop.f32.mrb[18].mxu0  ;;  %v723_v21 = vpop.f32.mrb[23].mxu1  ;;  %v834_v24 = vadd.f32 %v3781_v15, %v695_v25 }
 0x296   : > { %v3783_v26 = vpop.f32.mrb[19].mxu0 }
 0x297   : > { %v3784_v27 = vadd.f32 %v3783_v26, %v3782_v20 }
 0x298   : > { %v730_v28 = vpop.f32.mrb[24].mxu1 }
 0x299   : > { %v731_v29 = vadd.f32 %v730_v28, %v600_v44  ;;  %v3785_v30 = vpop.f32.mrb[20].mxu0  ;;  %v732_v32 = vpop.f32.mrb[25].mxu1  ;;  %v845_v36 = vadd.f32 %v3784_v27, %v704_v53 }
 0x29a   : > { %v3786_v37 = vpop.f32.mrb[21].mxu0 }
 0x29b   : > { %v3787_v38 = vadd.f32 %v3786_v37, %v3785_v30 }
 0x29c   : > { %v739_v43 = vpop.f32.mrb[26].mxu1 }
 0x29d   : > { %v740_v46 = vadd.f32 %v739_v43, %v607_v42  ;;  %v3788_v47 = vpop.f32.mrb[22].mxu0  ;;  %v741_v48 = vpop.f32.mrb[27].mxu1  ;;  %v856_v50 = vadd.f32 %v3787_v38, %v713_v10 }
 0x29e   : > { %v3789_v55 = vpop.f32.mrb[23].mxu0 }
 0x29f   : > { %v3790_v57 = vadd.f32 %v3789_v55, %v3788_v47 }
 0x2a0   : > { %v748_v58 = vpop.f32.mrb[28].mxu1 }
 0x2a1   : > { %v749_v60 = vadd.f32 %v748_v58, %v614_v23  ;;  %v3791_v61 = vpop.f32.mrb[24].mxu0  ;;  %v750_v62 = vpop.f32.mrb[29].mxu1  ;;  %v867_v34 = vadd.f32 %v3790_v57, %v722_v19 }
 0x2a2   : > { %v3792_v39 = vpop.f32.mrb[25].mxu0 }
 0x2a3   : > { %v3793_v40 = vadd.f32 %v3792_v39, %v3791_v61 }
 0x2a4   : > { %v757_v44 = vpop.f32.mrb[30].mxu1 }
 0x2a5   : > { %v758_v45 = vadd.f32 %v757_v44, %v621_v9  ;;  %v3794_v52 = vpop.f32.mrb[26].mxu0  ;;  %v759_v54 = vpop.f32.mrb[31].mxu1  ;;  %v878_v56 = vadd.f32 %v3793_v40, %v731_v29 }
 0x2a6   : > { %v3795_v51 = vpop.f32.mrb[27].mxu0 }
 0x2a7   : > { %v3796_v25 = vadd.f32 %v3795_v51, %v3794_v52 }
 0x2a8   : > { %v982_v42 = vpop.f32.mrb[32].mxu1 }
 0x2a9   : > { %v3797_v49 = vpop.f32.mrb[28].mxu0  ;;  %v983_v41 = vadd.f32 %v982_v42, %v834_v24  ;;  %v984_v33 = vpop.f32.mrb[33].mxu1  ;;  %v889_v59 = vadd.f32 %v3796_v25, %v740_v46 }
 0x2aa   : > { %v3798_v35 = vpop.f32.mrb[29].mxu0 }
 0x2ab   : > { %v3799_v53 = vadd.f32 %v3798_v35, %v3797_v49 }
 0x2ac   : > { %v989_v23 = vpop.f32.mrb[34].mxu1 }
 0x2ad   : > { %v3800_v0 = vpop.f32.mrb[30].mxu0  ;;  %v990_v17 = vadd.f32 %v989_v23, %v845_v36  ;;  %v991_v18 = vpop.f32.mrb[35].mxu1  ;;  %v900_v1 = vadd.f32 %v3799_v53, %v749_v60 }
 0x2ae   : > { %v3801_v10 = vpop.f32.mrb[31].mxu0 }
 0x2af   : > { %v3802_v11 = vadd.f32 %v3801_v10, %v3800_v0 }
 0x2b0   : > { %v996_v9 = vpop.f32.mrb[36].mxu1 }
 0x2b1   : > { %v997_v12 = vadd.f32 %v996_v9, %v856_v50  ;;  %v3835_v14 = vpop.f32.mrb[32].mxu0  ;;  %v998_v15 = vpop.f32.mrb[37].mxu1  ;;  %v911_v16 = vadd.f32 %v3802_v11, %v758_v45 }
 0x2b2   : > { %v3836_v19 = vpop.f32.mrb[33].mxu0 }
 0x2b3   : > { %v3837_v20 = vadd.f32 %v3836_v19, %v3835_v14 }
 0x2b4   : > { %v1003_v21 = vpop.f32.mrb[38].mxu1 }
 0x2b5   : > { %v1104_v24 = vadd.f32 %v3837_v20, %v983_v41  ;;  %v1004_v26 = vadd.f32 %v1003_v21, %v867_v34  ;;  %v3838_v27 = vpop.f32.mrb[34].mxu0  ;;  %v1005_v28 = vpop.f32.mrb[39].mxu1 }
 0x2b6   : > { %v3839_v29 = vpop.f32.mrb[35].mxu0 }
 0x2b7   : > { %v3840_v30 = vadd.f32 %v3839_v29, %v3838_v27  ;;  %v5115_v52 = vmul.f32 0.00390625, %v1104_v24 }
 0x2b8   : > { %v1010_v32 = vpop.f32.mrb[40].mxu1 }
 0x2b9   : > { %v1111_v36 = vadd.f32 %v3840_v30, %v990_v17  ;;  %v1011_v37 = vadd.f32 %v1010_v32, %v878_v56  ;;  %v3841_v38 = vpop.f32.mrb[36].mxu0  ;;  %v1012_v43 = vpop.f32.mrb[41].mxu1  ;;  %v1164_v33 = vmul.f32 %v5115_v52, %v5115_v52 }
 0x2ba   : > { %v3842_v46 = vpop.f32.mrb[37].mxu0 }
 0x2bb   : > { %v3843_v47 = vadd.f32 %v3842_v46, %v3841_v38 }
 0x2bc   : > { %v1017_v48 = vpop.f32.mrb[42].mxu1 }
 0x2bd   : > { %v1118_v50 = vadd.f32 %v3843_v47, %v997_v12  ;;  %v1018_v55 = vadd.f32 %v1017_v48, %v889_v59  ;;  %v3844_v57 = vpop.f32.mrb[38].mxu0  ;;  %v1019_v58 = vpop.f32.mrb[43].mxu1  ;;  %v5119_v59 = vmul.f32 0.00390625, %v1111_v36 }
 0x2be   : > { %v3845_v60 = vpop.f32.mrb[39].mxu0 }
 0x2bf   : > { %v3846_v61 = vadd.f32 %v3845_v60, %v3844_v57  ;;  %v5121_v18 = vmul.f32 0.00390625, %v1118_v50  ;;  %v1165_v10 = vmul.f32 %v5119_v59, %v5119_v59 }
 0x2c0   : > { %v1024_v62 = vpop.f32.mrb[44].mxu1 }
 0x2c1   : > { %v1125_v34 = vadd.f32 %v3846_v61, %v1004_v26  ;;  %v1025_v39 = vadd.f32 %v1024_v62, %v900_v1  ;;  %v3847_v40 = vpop.f32.mrb[40].mxu0  ;;  %v1026_v44 = vpop.f32.mrb[45].mxu1  ;;  %v1166_v20 = vmul.f32 %v5121_v18, %v5121_v18  ;;  %v4410_v61 = vld [vmem:[#allocation5] sm:$0xff] }
 0x2c2   : > { %v3848_v45 = vpop.f32.mrb[41].mxu0 }
 0x2c3   : > { %v3849_v54 = vadd.f32 %v3848_v45, %v3847_v40  ;;  %v1159_v21 = vmul.f32 0.00390625, %v1125_v34  ;;  %v4559_v34 = vmov 34   ;;  %v4411_v40 = vld [vmem:[#allocation5 + $0x8] sm:$0xff] }
 0x2c4   : > { %v1031_v56 = vpop.f32.mrb[46].mxu1  ;;  %4381 = vset.pattern.permute.xlu1 %v4559_v34  ;;  %4380 = vset.pattern.permute.xlu0 %v4559_v34 }
 0x2c5   : > { %v1132_v51 = vadd.f32 %v3849_v54, %v1011_v37  ;;  %v1032_v25 = vadd.f32 %v1031_v56, %v911_v16  ;;  %v3850_v42 = vpop.f32.mrb[42].mxu0  ;;  %v1033_v49 = vpop.f32.mrb[47].mxu1  ;;  %v1167_v36 = vmul.f32 %v1159_v21, %v1159_v21  ;;  %v5127_v54 = vld [vmem:[#allocation5 + $0x10] sm:$0xff] }
 0x2c6   : > { %v3851_v41 = vpop.f32.mrb[43].mxu0 }
 0x2c7   : > { %v1160_v35 = vmul.f32 0.00390625, %v1132_v51  ;;  %v3852_v53 = vadd.f32 %v3851_v41, %v3850_v42 }
 0x2c9   : > { %v1168_v23 = vsub.f32 %v1160_v35, %v1164_v33  ;;  %v1139_v0 = vadd.f32 %v3852_v53, %v1018_v55  ;;  %v3853_v17 = vpop.f32.mrb[44].mxu0 }
 0x2ca   : > { %v3854_v1 = vpop.f32.mrb[45].mxu0 }
 0x2cb   : > { %v1172_v11 = vmax.f32 %v1168_v23, 0.0  ;;  %v1161_v9 = vmul.f32 0.00390625, %v1139_v0  ;;  %v3855_v12 = vadd.f32 %v3854_v1, %v3853_v17  ;;  %v4561_v1 = vmov 35  }
 0x2cd   : > { %v1176_v14 = vadd.f32 1e-05, %v1172_v11  ;;  %v1169_v15 = vsub.f32 %v1161_v9, %v1165_v10  ;;  %v1146_v16 = vadd.f32 %v3855_v12, %v1025_v39  ;;  %v3856_v19 = vpop.f32.mrb[46].mxu0 }
 0x2ce   : > { %v3857_v24 = vpop.f32.mrb[47].mxu0 }
 0x2cf   : > { %4394 = vrsqrt.f32 %v1176_v14  ;;  %v1173_v26 = vmax.f32 %v1169_v15, 0.0  ;;  %v1162_v27 = vmul.f32 0.00390625, %v1146_v16  ;;  %v3858_v28 = vadd.f32 %v3857_v24, %v3856_v19 }
 0x2d0   : > { %v4562_v16 = vmov 36  }
 0x2d1   : > { %v1177_v29 = vadd.f32 1e-05, %v1173_v26  ;;  %v1170_v30 = vsub.f32 %v1162_v27, %v1166_v20  ;;  %v1153_v32 = vadd.f32 %v3858_v28, %v1032_v25  ;;  %v5130_v25 = vld [vmem:[#allocation5 + $0x18] sm:$0xff]  ;;  %v1313_v20 = vsel %vm1312_vm2, %v4410_v61, 0 }
 0x2d2   : > { %v5142_v24 = vand.u32 4294901760, %v1313_v20 }
 0x2d3   : > { %4396 = vrsqrt.f32 %v1177_v29  ;;  %v1174_v37 = vmax.f32 %v1170_v30, 0.0  ;;  %v1163_v38 = vmul.f32 0.00390625, %v1153_v32 }
 0x2d4   : > { %v5149_v32 = vsub.f32 %v1313_v20, %v5142_v24 }
 0x2d5   : > { %v1178_v43 = vadd.f32 1e-05, %v1174_v37  ;;  %v1171_v46 = vsub.f32 %v1163_v38, %v1167_v36 }
 0x2d7   : > { %4398 = vrsqrt.f32 %v1178_v43  ;;  %v1175_v47 = vmax.f32 %v1171_v46, 0.0 }
 0x2d9   : > { %v4395_v48 = vpop.eup %4394  ;;  %v1179_v50 = vadd.f32 1e-05, %v1175_v47 }
 0x2da   : > { %1188 = vrot.lane.b32.xlu1 %v4395_v48, %s4557_s15 }
 0x2db   : > { %4400 = vrsqrt.f32 %v1179_v50  ;;  %v1396_v50 = vand.u32 4294901760, %v5149_v32 }
 0x2dd   : > { %v4397_v55 = vpop.eup %4396 }
 0x2de   : > { %1190 = vrot.lane.b32.xlu1 %v4397_v55, %s4557_s15 }
 0x2e1   : > { %v4399_v57 = vpop.eup %4398 }
 0x2e2   : > { %1192 = vrot.lane.b32.xlu1 %v4399_v57, %s4557_s15 }
 0x2e5   : > { %v4401_v58 = vpop.eup %4400 }
 0x2e6   : > { %1194 = vrot.lane.b32.xlu1 %v4401_v58, %s4557_s15 }
 0x34c   : > { %v1189_v60 = vpop.permute.xlu1 %1188 }
 0x34d   : > { %v1200_v62 = vmul.f32 %v4410_v61, %v1189_v60 }
 0x34f   : > { %1208 = vrot.lane.b32.xlu0 %v1200_v62, %s4558_s17 }
 0x350   : > { %v1191_v39 = vpop.permute.xlu1 %1190 }
 0x351   : > { %v1201_v44 = vmul.f32 %v4411_v40, %v1191_v39 }
 0x353   : > { %1210 = vrot.lane.b32.xlu1 %v1201_v44, %s4558_s17 }
 0x354   : > { %v1193_v45 = vpop.permute.xlu1 %1192 }
 0x355   : > { %v1202_v56 = vmul.f32 %v5127_v54, %v1193_v45 }
 0x357   : > { %1212 = vrot.lane.b32.xlu0 %v1202_v56, %s4558_s17 }
 0x358   : > { %v1195_v51 = vpop.permute.xlu1 %1194 }
 0x359   : > { %v1203_v42 = vmul.f32 %v5130_v25, %v1195_v51 }
 0x35b   : > { %1214 = vrot.lane.b32.xlu1 %v1203_v42, %s4558_s17 }
 0x3c1   : > { %v1209_v49 = vpop.permute.xlu0 %1208 }
 0x3c2   : > { %v1220_v41 = vmul.f32 %v1209_v49, %v5115_v52 }
 0x3c4   : > { %1228 = vrot.lane.b32.xlu0 %v1220_v41, %s4560_s27 }
 0x3c5   : > { %v1211_v33 = vpop.permute.xlu1 %1210 }
 0x3c6   : > { %v1221_v35 = vmul.f32 %v1211_v33, %v5119_v59 }
 0x3c8   : > { %1230 = vrot.lane.b32.xlu1 %v1221_v35, %s4560_s27 }
 0x3c9   : > { %v1213_v53 = vpop.permute.xlu0 %1212 }
 0x3ca   : > { %v1222_v23 = vmul.f32 %v1213_v53, %v5121_v18 }
 0x3cc   : > { %1232 = vrot.lane.b32.xlu0 %v1222_v23, %s4560_s27 }
 0x3cd   : > { %v1215_v0 = vpop.permute.xlu1 %1214 }
 0x3ce   : > { %v1223_v17 = vmul.f32 %v1215_v0, %v1159_v21  ;;  %v1315_v21 = vsel %vm1312_vm2, %v4411_v40, 0 }
 0x3cf   : > { %v5144_v28 = vand.u32 4294901760, %v1315_v21 }
 0x3d0   : > { %1245 = vperm.xlu0 %4380, %v1200_v62   ;;  %1234 = vrot.lane.b32.xlu1 %v1223_v17, %s4560_s27 }
 0x3d1   : > { %v5152_v43 = vsub.f32 %v1315_v21, %v5144_v28 }
 0x3d4   : > { %1249 = vperm.xlu1 %4381, %v1201_v44   ;;  %4383 = vset.pattern.permute.xlu0 %v4561_v1 }
 0x3d8   : > { %1253 = vperm.xlu1 %4381, %v1202_v56  }
 0x3dc   : > { %1257 = vperm.xlu1 %4381, %v1203_v42  }
 0x3e0   : > { %4382 = vset.pattern.permute.xlu1 %v4561_v1 }
 0x436   : > { %v1229_v52 = vpop.permute.xlu0 %1228 }
 0x437   : > { %v1240_v10 = vsub.f32 %v4410_v61, %v1229_v52 }
 0x439   : > { %1270 = vperm.xlu1 %4382, %v1240_v10  }
 0x43a   : > { %v1231_v11 = vpop.permute.xlu1 %1230 }
 0x43b   : > { %v1241_v59 = vsub.f32 %v4411_v40, %v1231_v11 }
 0x43d   : > { %1275 = vperm.xlu0 %4383, %v1241_v59  }
 0x43e   : > { %v1233_v9 = vpop.permute.xlu0 %1232 }
 0x43f   : > { %v1242_v18 = vsub.f32 %v5127_v54, %v1233_v9 }
 0x441   : > { %1280 = vperm.xlu0 %4383, %v1242_v18  }
 0x442   : > { %v1235_v12 = vpop.permute.xlu1 %1234 }
 0x443   : > { %v1243_v14 = vsub.f32 %v5130_v25, %v1235_v12 }
 0x445   : > { %1285 = vperm.xlu1 %4382, %v1243_v14   ;;  %4384 = vset.pattern.permute.xlu0 %v4562_v16 }
 0x446   : > { %1297 = vperm.xlu0 %4384, %v4410_v61   ;;  %v1407_v61 = vand.u32 4294901760, %v5152_v43 }
 0x448   : > { %v5183_v49 = vsub.f32 %v5152_v43, %v1407_v61 }
 0x449   : > { %4385 = vset.pattern.permute.xlu1 %v4562_v16 }
 0x44a   : > { %1301 = vperm.xlu1 %4385, %v4411_v40   ;;  %1309 = vperm.xlu0 %4384, %v5130_v25  }
 0x44e   : > { %1305 = vperm.xlu1 %4385, %v5127_v54  }
 0x44f   : > { %v1246_v26 = vpop.permute.xlu0 %1245 }
 0x450   : > { %v1260_v29 = vmul.f32 %v1246_v26, %v4775_v63  ;;  %v1261_v30 = vmul.f32 %v1246_v26, %v4777_v3  ;;  %v1317_v3 = vsel %vm1312_vm2, %v5127_v54, 0 }
 0x453   : > { %v1250_v15 = vpop.permute.xlu1 %1249 }
 0x454   : > { %v1262_v46 = vmul.f32 %v1250_v15, %v4779_v4  ;;  %v1263_v47 = vmul.f32 %v1250_v15, %v4781_v5  ;;  %v5165_v4 = vsub.f32 %v5149_v32, %v1396_v50  ;;  %v5167_v5 = vand.u32 4294901760, %v1317_v3 }
 0x456   : > { %v5203_v59 = vsub.f32 %v1317_v3, %v5167_v5  ;;  %v1398_v20 = vand.u32 4294901760, %v5165_v4 }
 0x457   : > { %v1254_v19 = vpop.permute.xlu1 %1253 }
 0x458   : > { %v1264_v39 = vmul.f32 %v1254_v19, %v4783_v6  ;;  %v1265_v40 = vmul.f32 %v1254_v19, %v4785_v7  ;;  %v1319_v7 = vsel %vm1312_vm2, %v5130_v25, 0 }
 0x459   : > { %v5212_v14 = vand.u32 4294901760, %v1319_v7 }
 0x45b   : > { %v1258_v27 = vpop.permute.xlu1 %1257 }
 0x45c   : > { %v1266_v35 = vmul.f32 %v1258_v27, %v4801_v13  ;;  %v1267_v53 = vmul.f32 %v1258_v27, %v4787_v8 }
 0x4b8   : > { %v1271_v36 = vpop.permute.xlu1 %1270 }
 0x4b9   : > { %v1288_v37 = vadd.f32 %v1271_v36, %v1260_v29  ;;  %v1289_v38 = vadd.f32 %v1271_v36, %v1261_v30 }
 0x4bb   : > { %v1321_v48 = vand.u32 4294901760, %v1289_v38  ;;  %v1323_v55 = vand.u32 4294901760, %v1288_v37 }
 0x4bc   : > { %v1276_v63 = vpop.permute.xlu0 %1275 }
 0x4bd   : > { %v5159_v57 = vsub.f32 %v1289_v38, %v1321_v48  ;;  %v1290_v58 = vadd.f32 %v1276_v63, %v1262_v46  ;;  %v1291_v60 = vadd.f32 %v1276_v63, %v1263_v47  ;;  %v5172_v45 = vsub.f32 %v1288_v37, %v1323_v55 }
 0x4bf   : > { %v1325_v62 = vand.u32 4294901760, %v1291_v60  ;;  %v1327_v34 = vand.u32 4294901760, %v1290_v58  ;;  %v1440_v44 = vand.u32 4294901760, %v5159_v57  ;;  %v1446_v17 = vand.u32 4294901760, %v5172_v45 }
 0x4c0   : > { %v1281_v54 = vpop.permute.xlu0 %1280 }
 0x4c1   : > { %v5174_v56 = vpack.c.bf16 %v1327_v34, %v1323_v55  ;;  %v5176_v51 = vsub.f32 %v1291_v60, %v1325_v62  ;;  %v5178_v42 = vsub.f32 %v1290_v58, %v1327_v34  ;;  %v1292_v41 = vadd.f32 %v1281_v54, %v1264_v39 }
 0x4c2   : > { %v1293_v6 = vadd.f32 %v1281_v54, %v1265_v40  ;;  %v5185_v33 = vpack.c.bf16 %v1325_v62, %v1321_v48  ;;  %v1441_v11 = vsub.f32 %v5159_v57, %v1440_v44  ;;  %v1447_v21 = vsub.f32 %v5172_v45, %v1446_v17 }
 0x4c3   : > { %v1452_v23 = vand.u32 4294901760, %v5176_v51  ;;  %v1458_v0 = vand.u32 4294901760, %v5178_v42  ;;  %v1331_v52 = vand.u32 4294901760, %v1292_v41  ;;  %v1418_v48 = vand.u32 4294901760, %v5203_v59 }
 0x4c4   : > { %v1329_v1 = vand.u32 4294901760, %v1293_v6  ;;  %4076 = vmatprep.subr.bf16.mxu1 %v5185_v33  ;;  %v1286_v10 = vpop.permute.xlu1 %1285  ;;  %v1442_v29 = vand.u32 4294901760, %v1441_v11  ;;  %v5233_v55 = vsub.f32 %v1319_v7, %v5212_v14  ;;  %v1448_v62 = vand.u32 4294901760, %v1447_v21 }
 0x4c5   : > { %4078 = vmatpush1.bf16.msra.mxu1 %v5174_v56  ;;  %v1294_v13 = vadd.f32 %v1286_v10, %v1266_v35  ;;  %v1295_v25 = vadd.f32 %v1286_v10, %v1267_v53  ;;  %v1453_v8 = vsub.f32 %v5176_v51, %v1452_v23  ;;  %v1459_v9 = vsub.f32 %v5178_v42, %v1458_v0 }
 0x4c6   : > { %v5208_v18 = vsub.f32 %v1293_v6, %v1329_v1  ;;  %v5210_v12 = vsub.f32 %v1292_v41, %v1331_v52  ;;  %v1409_v40 = vand.u32 4294901760, %v5183_v49  ;;  %v1419_v54 = vsub.f32 %v5203_v59, %v1418_v48 }
 0x4c7   : > { %v1333_v15 = vand.u32 4294901760, %v1295_v25  ;;  %v1335_v16 = vand.u32 4294901760, %v1294_v13  ;;  %v1454_v19 = vand.u32 4294901760, %v1453_v8  ;;  %v1460_v46 = vand.u32 4294901760, %v1459_v9 }
 0x4c8   : > { %v1464_v26 = vand.u32 4294901760, %v5208_v18  ;;  %v1470_v27 = vand.u32 4294901760, %v5210_v12  ;;  %v1429_v41 = vand.u32 4294901760, %v5233_v55  ;;  %v4091_v49 = vpack.c.bf16 %v5176_v51, %v5159_v57 }
 0x4c9   : > { %v5220_v30 = vpack.c.bf16 %v1335_v16, %v1331_v52  ;;  %v5222_v36 = vsub.f32 %v1295_v25, %v1333_v15  ;;  %v5224_v37 = vsub.f32 %v1294_v13, %v1335_v16  ;;  %v5226_v38 = vpack.c.bf16 %v1333_v15, %v1329_v1 }
 0x4ca   : > { %v1471_v47 = vsub.f32 %v5210_v12, %v1470_v27  ;;  %v4083_v58 = vpack.c.bf16 %v1454_v19, %v1442_v29  ;;  %v1465_v60 = vsub.f32 %v5208_v18, %v1464_v26  ;;  %v4085_v39 = vpack.c.bf16 %v1460_v46, %v1448_v62 }
 0x4cb   : > { %v1476_v63 = vand.u32 4294901760, %v5222_v36  ;;  %v1482_v3 = vand.u32 4294901760, %v5224_v37  ;;  %4080 = vmatprep.subr.bf16.mxu1 %v5226_v38  ;;  %v1420_v10 = vand.u32 4294901760, %v1419_v54  ;;  %v1430_v11 = vsub.f32 %v5233_v55, %v1429_v41 }
 0x4cc   : > { %4082 = vmatpush1.bf16.msra.mxu1 %v5220_v30  ;;  %v1472_v6 = vand.u32 4294901760, %v1471_v47  ;;  %v1466_v35 = vand.u32 4294901760, %v1465_v60  ;;  %v4093_v25 = vpack.c.bf16 %v5178_v42, %v5172_v45  ;;  %v4095_v8 = vpack.c.bf16 %v5222_v36, %v5208_v18 }
 0x4cd   : > { %v1483_v34 = vsub.f32 %v5224_v37, %v1482_v3  ;;  %4084 = vmatprep.subr.bf16.mxu1 %v4083_v58  ;;  %v1477_v4 = vsub.f32 %v5222_v36, %v1476_v63  ;;  %v1431_v13 = vand.u32 4294901760, %v1430_v11  ;;  %v4097_v9 = vpack.c.bf16 %v5224_v37, %v5210_v12 }
 0x4ce   : > { %v4107_v15 = vpack.c.bf16 %v1452_v23, %v1440_v44  ;;  %v4109_v57 = vpack.c.bf16 %v1458_v0, %v1446_v17  ;;  %v4111_v44 = vpack.c.bf16 %v1476_v63, %v1464_v26  ;;  %v4113_v45 = vpack.c.bf16 %v1482_v3, %v1470_v27 }
 0x4cf   : > { %v1484_v7 = vand.u32 4294901760, %v1483_v34  ;;  %1399 = vmatmul.mubr.f32.vlgmr.msra.gmra.mrb[48].mxu1 %v1398_v20  ;;  %v1478_v53 = vand.u32 4294901760, %v1477_v4 }
 0x4d0   : > { %4086 = vmatpush1.bf16.msra.mxu1 %v4085_v39  ;;  %1404 = vmatprep.mubr.f32.mxu1 %v4556_v31 }
 0x4d1   : > { %v4087_v1 = vpack.c.bf16 %v1478_v53, %v1466_v35  ;;  %v4089_v52 = vpack.c.bf16 %v1484_v7, %v1472_v6 }
 0x4d3   : > { %1410 = vmatmul.mubr.f32.gmra.mrb[50].mxu1 %v1409_v40  ;;  %4088 = vmatprep.subr.bf16.mxu1 %v4087_v1 }
 0x4d4   : > { %4090 = vmatpush1.bf16.msra.mxu1 %v4089_v52  ;;  %1415 = vmatprep.mubr.f32.mxu1 %v4556_v31 }
 0x4d5   : > { %4092 = vmatprep.subr.bf16.mxu1 %v4091_v49 }
 0x4d7   : > { %1421 = vmatmul.mubr.f32.gmra.mrb[52].mxu1 %v1420_v10 }
 0x4d8   : > { %1426 = vmatprep.mubr.f32.mxu1 %v4556_v31 }
 0x4db   : > { %1432 = vmatmul.mubr.f32.gmra.mrb[54].mxu1 %v1431_v13 }
 0x4dc   : > { %1542 = vmatprep.mubr.f32.mxu1 %v4556_v31 }
 0x4df   : > { %1544 = vmatmul.mubr.f32.vlgmr.msra.gmra.mrb[48].mxu1 %v5142_v24 }
 0x4e0   : > { %4094 = vmatpush1.bf16.msra.mxu1 %v4093_v25  ;;  %1549 = vmatprep.mubr.f32.mxu1 %v4556_v31 }
 0x4e1   : > { %4096 = vmatprep.subr.bf16.mxu1 %v4095_v8 }
 0x4e3   : > { %1551 = vmatmul.mubr.f32.gmra.mrb[50].mxu1 %v5144_v28 }
 0x4e4   : > { %4098 = vmatpush1.bf16.msra.mxu1 %v4097_v9  ;;  %1556 = vmatprep.mubr.f32.mxu1 %v4556_v31 }
 0x4e5   : > { %4100 = vmatprep.subr.bf16.mxu1 %v5185_v33 }
 0x4e7   : > { %1558 = vmatmul.mubr.f32.gmra.mrb[52].mxu1 %v5167_v5 }
 0x4e8   : > { %1563 = vmatprep.mubr.f32.mxu1 %v4556_v31 }
 0x4eb   : > { %1565 = vmatmul.mubr.f32.gmra.mrb[54].mxu1 %v5212_v14 }
 0x4ec   : > { %1651 = vmatprep.mubr.f32.mxu1 %v4556_v31 }
 0x4ef   : > { %1654 = vmatmul.mubr.f32.vlgmr.msra.gmra.mrb[48].mxu1 %v5149_v32  ;;  %v1298_v32 = vpop.permute.xlu0 %1297 }
 0x4f0   : > { %4102 = vmatpush1.bf16.msra.mxu1 %v5174_v56  ;;  %1659 = vmatprep.mubr.f32.mxu1 %v4556_v31 }
 0x4f1   : > { %4104 = vmatprep.subr.bf16.mxu1 %v5226_v38 }
 0x4f3   : > { %1662 = vmatmul.mubr.f32.gmra.mrb[50].mxu1 %v5152_v43  ;;  %v1310_v62 = vpop.permute.xlu0 %1309 }
 0x4f4   : > { %4106 = vmatpush1.bf16.msra.mxu1 %v5220_v30  ;;  %1667 = vmatprep.mubr.f32.mxu1 %v4556_v31 }
 0x4f5   : > { %4108 = vmatprep.subr.bf16.mxu1 %v4107_v15 }
 0x4f7   : > { %1670 = vmatmul.mubr.f32.gmra.mrb[52].mxu1 %v5203_v59 }
 0x4f8   : > { %1675 = vmatprep.mubr.f32.mxu1 %v4556_v31 }
 0x4fb   : > { %1678 = vmatmul.mubr.f32.gmra.mrb[54].mxu1 %v5233_v55 }
 0x4fc   : > { %1756 = vmatprep.mubr.f32.mxu1 %v4556_v31 }
 0x4ff   : > { %1760 = vmatmul.mubr.f32.vlgmr.msra.gmra.mrb[48].mxu1 %v1396_v50 }
 0x500   : > { %4110 = vmatpush1.bf16.msra.mxu1 %v4109_v57  ;;  %1765 = vmatprep.mubr.f32.mxu1 %v4556_v31 }
 0x501   : > { %4112 = vmatprep.subr.bf16.mxu1 %v4111_v44 }
 0x503   : > { %1769 = vmatmul.mubr.f32.gmra.mrb[50].mxu1 %v1407_v61 }
 0x504   : > { %4114 = vmatpush1.bf16.msra.mxu1 %v4113_v45  ;;  %1774 = vmatprep.mubr.f32.mxu1 %v4556_v31 }
 0x505   : > { %4116 = vmatprep.subr.bf16.mxu1 %v5185_v33 }
 0x507   : > { %1778 = vmatmul.mubr.f32.gmra.mrb[52].mxu1 %v1418_v48 }
 0x508   : > { %1783 = vmatprep.mubr.f32.mxu1 %v4556_v31 }
 0x50b   : > { %1787 = vmatmul.mubr.f32.gmra.mrb[54].mxu1 %v1429_v41 }
 0x50c   : > { %1881 = vmatprep.mubr.f32.mxu1 %v4556_v31 }
 0x50f   : > { %1883 = vmatmul.mubr.f32.vlgmr.msra.gmra.mrb[48].mxu1 %v5142_v24 }
 0x510   : > { %4118 = vmatpush1.bf16.msra.mxu1 %v5174_v56  ;;  %1888 = vmatprep.mubr.f32.mxu1 %v4556_v31  ;;  %v1302_v56 = vpop.permute.xlu1 %1301 }
 0x511   : > { %4120 = vmatprep.subr.bf16.mxu1 %v5226_v38 }
 0x513   : > { %1890 = vmatmul.mubr.f32.gmra.mrb[50].mxu1 %v5144_v28 }
 0x514   : > { %4122 = vmatpush1.bf16.msra.mxu1 %v5220_v30  ;;  %1895 = vmatprep.mubr.f32.mxu1 %v4556_v31  ;;  %v1306_v20 = vpop.permute.xlu1 %1305 }
 0x515   : > { %2212 = vmatprep.subr.mxu1 %v4556_v31 }
 0x517   : > { %1897 = vmatmul.mubr.f32.gmra.mrb[52].mxu1 %v5167_v5 }
 0x518   : > { %1902 = vmatprep.mubr.f32.mxu1 %v4556_v31 }
 0x51b   : > { %1904 = vmatmul.mubr.f32.gmra.mrb[54].mxu1 %v5212_v14 }
 0x51c   : > { %1982 = vmatprep.mubr.f32.mxu1 %v4556_v31 }
 0x51f   : > { %1984 = vmatmul.mubr.f32.vlgmr.msra.gmra.mrb[48].mxu1 %v5142_v24 }
 0x520   : > { %1989 = vmatprep.mubr.f32.mxu1 %v4556_v31  ;;  %2213 = vmatpush1.msra.mxu1 %v4556_v31 }
 0x521   : > { %4139 = vmatprep.subr.bf16.mxu1 %v4555_v22 }
 0x523   : > { %1991 = vmatmul.mubr.f32.gmra.mrb[50].mxu1 %v5144_v28 }
 0x524   : > { %1996 = vmatprep.mubr.f32.mxu1 %v4556_v31 }
 0x527   : > { %1998 = vmatmul.mubr.f32.gmra.mrb[52].mxu1 %v5167_v5 }
 0x528   : > { %2003 = vmatprep.mubr.f32.mxu1 %v4556_v31 }
 0x52b   : > { %2005 = vmatmul.mubr.f32.gmra.mrb[54].mxu1 %v5212_v14 }
 0x5f2   : > { %v1985_v43 = vpop.f32.mrb[48].mxu1 }
 0x5f3   : > { %v4235_v50 = vadd.f32 %v1985_v43, %v1298_v32  ;;  %v1987_v24 = vpop.f32.mrb[49].mxu1 }
 0x5f4   : > { %v4236_v61 = vadd.f32 %v1987_v24, %v1298_v32 }
 0x5f5   : > { %v5338_v51 = vmax.f32 %v4235_v50, 0.0 }
 0x5f6   : > { %v5340_v42 = vmax.f32 %v4236_v61, 0.0  ;;  %v1992_v33 = vpop.f32.mrb[50].mxu1 }
 0x5f7   : > { %v5344_v28 = vmul.f32 %v5338_v51, %v5338_v51  ;;  %v5347_v5 = vand.u32 4294901760, %v5338_v51  ;;  %v4237_v23 = vadd.f32 %v1992_v33, %v1302_v56  ;;  %v1994_v0 = vpop.f32.mrb[51].mxu1 }
 0x5f8   : > { %v2020_v17 = vmul.f32 %v5340_v42, %v5340_v42  ;;  %v4238_v59 = vadd.f32 %v1994_v0, %v1302_v56  ;;  %v5352_v18 = vand.u32 4294901760, %v5340_v42 }
 0x5f9   : > { %v5356_v12 = vsub.f32 %v5338_v51, %v5347_v5  ;;  %v5358_v14 = vmax.f32 %v4237_v23, 0.0  ;;  %v5373_v36 = vand.u32 4294901760, %v5344_v28 }
 0x5fa   : > { %v5360_v16 = vmax.f32 %v4238_v59, 0.0  ;;  %v1999_v19 = vpop.f32.mrb[52].mxu1  ;;  %2277 = vmatprep.mubr.f32.mxu1 %v5352_v18  ;;  %v5365_v21 = vsub.f32 %v5340_v42, %v5352_v18  ;;  %v5380_v47 = vand.u32 4294901760, %v2020_v17 }
 0x5fb   : > { %v2099_v26 = vand.u32 4294901760, %v5356_v12  ;;  %v4239_v27 = vadd.f32 %v1999_v19, %v1306_v20  ;;  %v2001_v29 = vpop.f32.mrb[53].mxu1  ;;  %2279 = vmatmul.mubr.f32.vlgmr.msra.gmra.mrb[56].mxu1 %v5347_v5  ;;  %v5370_v30 = vand.u32 4294901760, %v5358_v14  ;;  %v5394_v3 = vmul.f32 %v5358_v14, %v5358_v14 }
 0x5fc   : > { %v4240_v37 = vadd.f32 %v2001_v29, %v1306_v20  ;;  %4140 = vmatpush3.bf16.msra.mxu1 %v4555_v22  ;;  %v5377_v38 = vand.u32 4294901760, %v5360_v16  ;;  %v2093_v46 = vand.u32 4294901760, %v5365_v21  ;;  %v2022_v58 = vmul.f32 %v5360_v16, %v5360_v16 }
 0x5fd   : > { %v5382_v48 = vmax.f32 %v4239_v27, 0.0  ;;  %4141 = vmatprep.subr.bf16.mxu1 %v4555_v22  ;;  %v2100_v55 = vsub.f32 %v5356_v12, %v2099_v26  ;;  %v5390_v63 = vsub.f32 %v5358_v14, %v5370_v30  ;;  %v5438_v9 = vand.u32 4294901760, %v5394_v3 }
 0x5fe   : > { %v5398_v60 = vmax.f32 %v4240_v37, 0.0  ;;  %v2006_v34 = vpop.f32.mrb[54].mxu1  ;;  %2284 = vmatprep.mubr.f32.mxu1 %v5377_v38  ;;  %v2094_v4 = vsub.f32 %v5365_v21, %v2093_v46  ;;  %v5406_v39 = vsub.f32 %v5360_v16, %v5377_v38  ;;  %v5447_v44 = vand.u32 4294901760, %v2022_v58 }
 0x5ff   : > { %v4241_v40 = vadd.f32 %v2006_v34, %v1310_v62  ;;  %v2008_v54 = vpop.f32.mrb[55].mxu1  ;;  %2286 = vmatmul.mubr.f32.gmra.mrb[58].mxu1 %v5370_v30  ;;  %v2101_v41 = vand.u32 4294901760, %v2100_v55  ;;  %v5410_v6 = vand.u32 4294901760, %v5382_v48  ;;  %v2114_v7 = vand.u32 4294901760, %v5390_v63 }
 0x600   : > { %v2024_v35 = vmul.f32 %v5398_v60, %v5398_v60  ;;  %v4242_v53 = vadd.f32 %v2008_v54, %v1310_v62  ;;  %4142 = vmatpush3.bf16.msra.mxu1 %v4555_v22  ;;  %v2095_v1 = vand.u32 4294901760, %v2094_v4  ;;  %v5417_v52 = vand.u32 4294901760, %v5398_v60 }
 0x601   : > { %v5419_v49 = vmax.f32 %v4241_v40, 0.0  ;;  %4143 = vmatprep.subr.bf16.mxu1 %v4555_v22  ;;  %v2108_v10 = vand.u32 4294901760, %v5406_v39  ;;  %v2115_v11 = vsub.f32 %v5390_v63, %v2114_v7  ;;  %v5428_v13 = vsub.f32 %v5382_v48, %v5410_v6 }
 0x602   : > { %v5430_v25 = vmax.f32 %v4242_v53, 0.0  ;;  %2096 = vmatprep.mubr.f32.mxu0 %v2095_v1  ;;  %2291 = vmatprep.mubr.f32.mxu1 %v5417_v52  ;;  %v5435_v8 = vsub.f32 %v5398_v60, %v5417_v52  ;;  %v5450_v45 = vsub.f32 %v2020_v17, %v5380_v47  ;;  %v5458_v24 = vand.u32 4294901760, %v2024_v35 }
 0x603   : > { %2102 = vmatmul.mubr.f32.vlgmr.msra.gmra.mrb[48].mxu0 %v2101_v41  ;;  %2293 = vmatmul.mubr.f32.gmra.mrb[60].mxu1 %v5410_v6  ;;  %v2109_v15 = vsub.f32 %v5406_v39, %v2108_v10  ;;  %v5445_v57 = vand.u32 4294901760, %v5419_v49  ;;  %v2129_v50 = vand.u32 4294901760, %v5428_v13  ;;  %v2116_v56 = vand.u32 4294901760, %v2115_v11 }
 0x604   : > { %4144 = vmatpush3.bf16.msra.mxu1 %v4555_v22  ;;  %v5454_v32 = vand.u32 4294901760, %v5430_v25  ;;  %v2123_v43 = vand.u32 4294901760, %v5435_v8  ;;  %2334 = vmatpush1.msra.mxu0 %v4556_v31  ;;  %v5468_v23 = vsub.f32 %v5344_v28, %v5373_v36  ;;  %v2023_v28 = vmul.f32 %v5382_v48, %v5382_v48 }
 0x605   : > { %v2110_v61 = vand.u32 4294901760, %v2109_v15  ;;  %4145 = vmatprep.subr.bf16.mxu1 %v4555_v22  ;;  %v5464_v33 = vsub.f32 %v5419_v49, %v5445_v57  ;;  %2623 = vmatprep.subr.mxu0 %v4556_v31  ;;  %v2130_v17 = vsub.f32 %v5428_v13, %v2129_v50  ;;  %v2026_v19 = vmul.f32 %v5430_v25, %v5430_v25 }
 0x606   : > { %2298 = vmatprep.mubr.f32.mxu1 %v5454_v32  ;;  %v2124_v0 = vsub.f32 %v5435_v8, %v2123_v43  ;;  %v5480_v59 = vsub.f32 %v5430_v25, %v5454_v32  ;;  %v2153_v27 = vand.u32 4294901760, %v5450_v45  ;;  %v5490_v29 = vsub.f32 %v2022_v58, %v5447_v44 }
 0x607   : > { %2111 = vmatprep.mubr.f32.mxu0 %v2110_v61  ;;  %2300 = vmatmul.mubr.f32.gmra.mrb[62].mxu1 %v5445_v57  ;;  %v2144_v20 = vand.u32 4294901760, %v5464_v33  ;;  %v2025_v62 = vmul.f32 %v5419_v49, %v5419_v49  ;;  %v2131_v34 = vand.u32 4294901760, %v2130_v17  ;;  %v2159_v4 = vand.u32 4294901760, %v5468_v23 }
 0x608   : > { %2117 = vmatmul.mubr.f32.gmra.mrb[50].mxu0 %v2116_v56  ;;  %2305 = vmatprep.mubr.f32.mxu1 %v5380_v47  ;;  %v2125_v37 = vand.u32 4294901760, %v2124_v0  ;;  %v2138_v55 = vand.u32 4294901760, %v5480_v59  ;;  %v5505_v54 = vand.u32 4294901760, %v2023_v28  ;;  %v5509_v41 = vsub.f32 %v5394_v3, %v5438_v9 }
 0x609   : > { %4146 = vmatpush3.bf16.msra.mxu1 %v4555_v22  ;;  %v2145_v40 = vsub.f32 %v5464_v33, %v2144_v20  ;;  %v2154_v53 = vsub.f32 %v5450_v45, %v2153_v27  ;;  %v5832_v1 = vand.u32 4294901760, %v5490_v29  ;;  %v5516_v11 = vand.u32 4294901760, %v2026_v19 }
 0x60a   : > { %2126 = vmatprep.mubr.f32.mxu0 %v2125_v37  ;;  %4147 = vmatprep.subr.bf16.mxu1 %v4555_v22  ;;  %v2139_v58 = vsub.f32 %v5480_v59, %v2138_v55  ;;  %v5519_v15 = vsub.f32 %v2024_v35, %v5458_v24  ;;  %v2160_v3 = vsub.f32 %v5468_v23, %v2159_v4  ;;  %v5834_v0 = vand.u32 4294901760, %v5509_v41 }
 0x60b   : > { %2307 = vmatmul.mubr.f32.gmra.mrb[64].mxu1 %v5373_v36  ;;  %v2146_v56 = vand.u32 4294901760, %v2145_v40  ;;  %v5528_v17 = vand.u32 4294901760, %v2025_v62  ;;  %v5531_v35 = vsub.f32 %v2023_v28, %v5505_v54  ;;  %v2155_v37 = vand.u32 4294901760, %v2154_v53 }
 0x60c   : > { %2132 = vmatmul.mubr.f32.gmra.mrb[52].mxu0 %v2131_v34  ;;  %2312 = vmatprep.mubr.f32.mxu1 %v5447_v44  ;;  %v2140_v61 = vand.u32 4294901760, %v2139_v58  ;;  %v2169_v34 = vsub.f32 %v5490_v29, %v5832_v1  ;;  %v5833_v58 = vand.u32 4294901760, %v5519_v15  ;;  %v5539_v40 = vsub.f32 %v2026_v19, %v5516_v11 }
 0x60d   : > { %4148 = vmatpush3.bf16.msra.mxu1 %v4555_v22  ;;  %v2161_v28 = vand.u32 4294901760, %v2160_v3  ;;  %v2175_v53 = vsub.f32 %v5509_v41, %v5834_v0  ;;  %v5549_v1 = vsub.f32 %v2025_v62, %v5528_v17 }
 0x60e   : > { %2141 = vmatprep.mubr.f32.mxu0 %v2140_v61  ;;  %4149 = vmatprep.subr.bf16.mxu1 %v4555_v22  ;;  %v2189_v61 = vand.u32 4294901760, %v5531_v35  ;;  %v2170_v19 = vand.u32 4294901760, %v2169_v34  ;;  %v2198_v3 = vand.u32 4294901760, %v5539_v40 }
 0x60f   : > { %2314 = vmatmul.mubr.f32.gmra.mrb[66].mxu1 %v5438_v9  ;;  %v2204_v34 = vand.u32 4294901760, %v5549_v1 }
 0x610   : > { %2147 = vmatmul.mubr.f32.gmra.mrb[54].mxu0 %v2146_v56  ;;  %2319 = vmatprep.mubr.f32.mxu1 %v5458_v24  ;;  %v2184_v56 = vsub.f32 %v5519_v15, %v5833_v58  ;;  %v2190_v62 = vsub.f32 %v5531_v35, %v2189_v61  ;;  %v2199_v0 = vsub.f32 %v5539_v40, %v2198_v3 }
 0x611   : > { %2156 = vmatprep.mubr.f32.mxu0 %v2155_v37  ;;  %4150 = vmatpush3.bf16.msra.mxu1 %v4555_v22  ;;  %v2176_v37 = vand.u32 4294901760, %v2175_v53  ;;  %v2205_v53 = vsub.f32 %v5549_v1, %v2204_v34 }
 0x612   : > { %4151 = vmatprep.subr.bf16.mxu1 %v4555_v22  ;;  %v2185_v58 = vand.u32 4294901760, %v2184_v56 }
 0x613   : > { %2321 = vmatmul.mubr.f32.gmra.mrb[68].mxu1 %v5505_v54 }
 0x614   : > { %2162 = vmatmul.mubr.f32.gmra.mrb[56].mxu0 %v2161_v28  ;;  %2326 = vmatprep.mubr.f32.mxu1 %v5516_v11  ;;  %v2191_v28 = vand.u32 4294901760, %v2190_v62 }
 0x615   : > { %2171 = vmatprep.mubr.f32.mxu0 %v2170_v19  ;;  %4152 = vmatpush3.bf16.msra.mxu1 %v4555_v22  ;;  %v2200_v19 = vand.u32 4294901760, %v2199_v0 }
 0x616   : > { %4153 = vmatprep.subr.bf16.mxu1 %v4555_v22 }
 0x617   : > { %2328 = vmatmul.mubr.f32.gmra.mrb[70].mxu1 %v5528_v17 }
 0x618   : > { %2177 = vmatmul.mubr.f32.gmra.mrb[58].mxu0 %v2176_v37  ;;  %2537 = vmatprep.mubr.f32.mxu1 %v2093_v46  ;;  %v2206_v46 = vand.u32 4294901760, %v2205_v53 }
 0x619   : > { %2186 = vmatprep.mubr.f32.mxu0 %v2185_v58  ;;  %4154 = vmatpush3.bf16.msra.mxu1 %v4555_v22 }
 0x61a   : > { %4219 = vmatprep.subr.bf16.mxu1 %v4555_v22 }
 0x61c   : > { %2192 = vmatmul.mubr.f32.gmra.mrb[60].mxu0 %v2191_v28  ;;  %2541 = vmatmul.mubr.f32.vlgmr.msra.gmra.mrb[72].mxu1 %v2099_v26  ;;  %v5850_v26 = vand.u32 4294901760, %v5519_v15 }
 0x61d   : > { %2201 = vmatprep.mubr.f32.mxu0 %v2200_v19  ;;  %2548 = vmatprep.mubr.f32.mxu1 %v2108_v10 }
 0x61e   : > { %4227 = vmatpush3.bf16.msra.mxu1 %v4555_v22 }
 0x61f   : > { %4220 = vmatprep.subr.bf16.mxu1 %v4555_v22 }
 0x620   : > { %2207 = vmatmul.mubr.f32.gmra.mrb[62].mxu0 %v2206_v46  ;;  %2552 = vmatmul.mubr.f32.gmra.mrb[74].mxu1 %v2114_v7 }
 0x621   : > { %2399 = vmatprep.mubr.f32.mxu0 %v5365_v21  ;;  %2559 = vmatprep.mubr.f32.mxu1 %v2123_v43  ;;  %v5849_v21 = vand.u32 4294901760, %v5509_v41 }
 0x622   : > { %4228 = vmatpush3.bf16.msra.mxu1 %v4555_v22 }
 0x623   : > { %4221 = vmatprep.subr.bf16.mxu1 %v4555_v22 }
 0x624   : > { %2402 = vmatmul.mubr.f32.vlgmr.msra.gmra.mrb[64].mxu0 %v5356_v12  ;;  %2563 = vmatmul.mubr.f32.gmra.mrb[76].mxu1 %v2129_v50  ;;  %v5848_v12 = vand.u32 4294901760, %v5490_v29 }
 0x625   : > { %2408 = vmatprep.mubr.f32.mxu0 %v5406_v39  ;;  %2570 = vmatprep.mubr.f32.mxu1 %v2138_v55 }
 0x626   : > { %4229 = vmatpush3.bf16.msra.mxu1 %v4555_v22  ;;  %2624 = vmatpush1.msra.mxu0 %v4556_v31 }
 0x627   : > { %4222 = vmatprep.subr.bf16.mxu1 %v4555_v22  ;;  %4155 = vmatprep.subr.bf16.mxu0 %v4555_v22 }
 0x628   : > { %2411 = vmatmul.mubr.f32.gmra.mrb[66].mxu0 %v5390_v63  ;;  %2574 = vmatmul.mubr.f32.gmra.mrb[78].mxu1 %v2144_v20 }
 0x629   : > { %2417 = vmatprep.mubr.f32.mxu0 %v5435_v8  ;;  %2581 = vmatprep.mubr.f32.mxu1 %v2153_v27 }
 0x62a   : > { %4230 = vmatpush3.bf16.msra.mxu1 %v4555_v22 }
 0x62b   : > { %4223 = vmatprep.subr.bf16.mxu1 %v4555_v22 }
 0x62c   : > { %2420 = vmatmul.mubr.f32.gmra.mrb[68].mxu0 %v5428_v13  ;;  %2585 = vmatmul.mubr.f32.gmra.mrb[80].mxu1 %v2159_v4 }
 0x62d   : > { %2426 = vmatprep.mubr.f32.mxu0 %v5480_v59  ;;  %2592 = vmatprep.mubr.f32.mxu1 %v5848_v12 }
 0x62e   : > { %4231 = vmatpush3.bf16.msra.mxu1 %v4555_v22 }
 0x62f   : > { %4224 = vmatprep.subr.bf16.mxu1 %v4555_v22 }
 0x630   : > { %2429 = vmatmul.mubr.f32.gmra.mrb[70].mxu0 %v5464_v33  ;;  %2596 = vmatmul.mubr.f32.gmra.mrb[82].mxu1 %v5849_v21 }
 0x631   : > { %2435 = vmatprep.mubr.f32.mxu0 %v5450_v45  ;;  %2603 = vmatprep.mubr.f32.mxu1 %v5850_v26 }
 0x632   : > { %4232 = vmatpush3.bf16.msra.mxu1 %v4555_v22 }
 0x633   : > { %4225 = vmatprep.subr.bf16.mxu1 %v4555_v22 }
 0x634   : > { %2438 = vmatmul.mubr.f32.gmra.mrb[72].mxu0 %v5468_v23  ;;  %2607 = vmatmul.mubr.f32.gmra.mrb[84].mxu1 %v2189_v61 }
 0x635   : > { %2444 = vmatprep.mubr.f32.mxu0 %v5490_v29  ;;  %2614 = vmatprep.mubr.f32.mxu1 %v2198_v3 }
 0x636   : > { %4233 = vmatpush3.bf16.msra.mxu1 %v4555_v22 }
 0x637   : > { %4226 = vmatprep.subr.bf16.mxu1 %v4555_v22 }
 0x638   : > { %2447 = vmatmul.mubr.f32.gmra.mrb[74].mxu0 %v5509_v41  ;;  %2618 = vmatmul.mubr.f32.gmra.mrb[86].mxu1 %v2204_v34 }
 0x639   : > { %2453 = vmatprep.mubr.f32.mxu0 %v5519_v15  ;;  %2823 = vmatprep.mubr.f32.mxu1 %v5417_v52 }
 0x63a   : > { %4234 = vmatpush3.bf16.msra.mxu1 %v4555_v22 }
 0x63c   : > { %2456 = vmatmul.mubr.f32.gmra.mrb[76].mxu0 %v5531_v35 }
 0x63d   : > { %2825 = vmatmul.mubr.f32.vlgmr.msra.gmra.mrb[88].mxu1 %v5410_v6  ;;  %2462 = vmatprep.mubr.f32.mxu0 %v5539_v40 }
 0x63e   : > { %2830 = vmatprep.mubr.f32.mxu1 %v5454_v32 }
 0x640   : > { %2465 = vmatmul.mubr.f32.gmra.mrb[78].mxu0 %v5549_v1 }
 0x641   : > { %2832 = vmatmul.mubr.f32.gmra.mrb[90].mxu1 %v5445_v57  ;;  %2688 = vmatprep.mubr.f32.mxu0 %v5352_v18 }
 0x642   : > { %2837 = vmatprep.mubr.f32.mxu1 %v5380_v47 }
 0x644   : > { %2690 = vmatmul.mubr.f32.vlgmr.msra.gmra.mrb[80].mxu0 %v5347_v5 }
 0x645   : > { %2839 = vmatmul.mubr.f32.gmra.mrb[92].mxu1 %v5373_v36  ;;  %2695 = vmatprep.mubr.f32.mxu0 %v5377_v38 }
 0x646   : > { %4156 = vmatpush3.bf16.msra.mxu0 %v4555_v22  ;;  %2844 = vmatprep.mubr.f32.mxu1 %v5447_v44 }
 0x647   : > { %4157 = vmatprep.subr.bf16.mxu0 %v4555_v22 }
 0x648   : > { %2697 = vmatmul.mubr.f32.gmra.mrb[82].mxu0 %v5370_v30 }
 0x649   : > { %2846 = vmatmul.mubr.f32.gmra.mrb[94].mxu1 %v5438_v9  ;;  %2702 = vmatprep.mubr.f32.mxu0 %v5417_v52 }
 0x64a   : > { %4158 = vmatpush3.bf16.msra.mxu0 %v4555_v22  ;;  %2851 = vmatprep.mubr.f32.mxu1 %v5458_v24 }
 0x64b   : > { %4159 = vmatprep.subr.bf16.mxu0 %v4555_v22 }
 0x64c   : > { %2704 = vmatmul.mubr.f32.gmra.mrb[84].mxu0 %v5410_v6 }
 0x64d   : > { %2853 = vmatmul.mubr.f32.gmra.mrb[96].mxu1 %v5505_v54  ;;  %2709 = vmatprep.mubr.f32.mxu0 %v5454_v32 }
 0x64e   : > { %4160 = vmatpush3.bf16.msra.mxu0 %v4555_v22  ;;  %2858 = vmatprep.mubr.f32.mxu1 %v5516_v11 }
 0x64f   : > { %4161 = vmatprep.subr.bf16.mxu0 %v4555_v22 }
 0x650   : > { %2711 = vmatmul.mubr.f32.gmra.mrb[86].mxu0 %v5445_v57 }
 0x651   : > { %2860 = vmatmul.mubr.f32.gmra.mrb[98].mxu1 %v5528_v17  ;;  %2716 = vmatprep.mubr.f32.mxu0 %v5380_v47 }
 0x652   : > { %4162 = vmatpush3.bf16.msra.mxu0 %v4555_v22 }
 0x653   : > { %4163 = vmatprep.subr.bf16.mxu0 %v4555_v22 }
 0x654   : > { %2718 = vmatmul.mubr.f32.gmra.mrb[88].mxu0 %v5373_v36 }
 0x655   : > { %2723 = vmatprep.mubr.f32.mxu0 %v5447_v44 }
 0x656   : > { %4164 = vmatpush3.bf16.msra.mxu0 %v4555_v22 }
 0x657   : > { %4165 = vmatprep.subr.bf16.mxu0 %v4555_v22 }
 0x658   : > { %2725 = vmatmul.mubr.f32.gmra.mrb[90].mxu0 %v5438_v9 }
 0x659   : > { %2730 = vmatprep.mubr.f32.mxu0 %v5458_v24 }
 0x65a   : > { %4166 = vmatpush3.bf16.msra.mxu0 %v4555_v22 }
 0x65b   : > { %4167 = vmatprep.subr.bf16.mxu0 %v4555_v22 }
 0x65c   : > { %2732 = vmatmul.mubr.f32.gmra.mrb[92].mxu0 %v5505_v54 }
 0x65d   : > { %2737 = vmatprep.mubr.f32.mxu0 %v5516_v11 }
 0x65e   : > { %4168 = vmatpush3.bf16.msra.mxu0 %v4555_v22 }
 0x65f   : > { %4169 = vmatprep.subr.bf16.mxu0 %v4555_v22 }
 0x660   : > { %2739 = vmatmul.mubr.f32.gmra.mrb[94].mxu0 %v5528_v17 }
 0x661   : > { %2809 = vmatprep.mubr.f32.mxu0 %v5352_v18 }
 0x662   : > { %4170 = vmatpush3.bf16.msra.mxu0 %v4555_v22 }
 0x665   : > { %2811 = vmatmul.mubr.f32.vlgmr.msra.gmra.mrb[96].mxu0 %v5347_v5 }
 0x666   : > { %2816 = vmatprep.mubr.f32.mxu0 %v5377_v38 }
 0x669   : > { %2818 = vmatmul.mubr.f32.gmra.mrb[98].mxu0 %v5370_v30 }
 0x66a   : > { %3084 = vmatprep.mubr.f32.mxu0 %v4556_v31 }
 0x6ce   : > { %v2280_v36 = vpop.f32.mrb[56].mxu1 }
 0x6cf   : > { %v2282_v47 = vpop.f32.mrb[57].mxu1 }
 0x6d2   : > { %v2287_v63 = vpop.f32.mrb[58].mxu1 }
 0x6d3   : > { %v2289_v39 = vpop.f32.mrb[59].mxu1 }
 0x6d6   : > { %v3891_v6 = vpop.f32.mrb[48].mxu0  ;;  %v2294_v7 = vpop.f32.mrb[60].mxu1 }
 0x6d7   : > { %v3892_v52 = vpop.f32.mrb[49].mxu0  ;;  %v2296_v10 = vpop.f32.mrb[61].mxu1 }
 0x6d8   : > { %v3893_v13 = vadd.f32 %v3892_v52, %v3891_v6 }
 0x6da   : > { %v2301_v18 = vpop.f32.mrb[62].mxu1  ;;  %v2281_v8 = vadd.f32 %v3893_v13, %v2280_v36 }
 0x6db   : > { %v3894_v22 = vpop.f32.mrb[50].mxu0  ;;  %v2303_v9 = vpop.f32.mrb[63].mxu1 }
 0x6dc   : > { %v3895_v5 = vpop.f32.mrb[51].mxu0 }
 0x6dd   : > { %v3896_v57 = vadd.f32 %v3895_v5, %v3894_v22 }
 0x6de   : > { %v2308_v38 = vpop.f32.mrb[64].mxu1 }
 0x6df   : > { %v3897_v44 = vpop.f32.mrb[52].mxu0  ;;  %v2310_v30 = vpop.f32.mrb[65].mxu1  ;;  %v2288_v45 = vadd.f32 %v3896_v57, %v2287_v63 }
 0x6e0   : > { %v3898_v32 = vpop.f32.mrb[53].mxu0 }
 0x6e1   : > { %v3899_v43 = vadd.f32 %v3898_v32, %v3897_v44 }
 0x6e2   : > { %v2315_v50 = vpop.f32.mrb[66].mxu1 }
 0x6e3   : > { %v3900_v24 = vpop.f32.mrb[54].mxu0  ;;  %v2317_v33 = vpop.f32.mrb[67].mxu1  ;;  %v2295_v23 = vadd.f32 %v3899_v43, %v2294_v7 }
 0x6e4   : > { %v3901_v59 = vpop.f32.mrb[55].mxu0 }
 0x6e5   : > { %v3902_v20 = vadd.f32 %v3901_v59, %v3900_v24 }
 0x6e6   : > { %v2322_v27 = vpop.f32.mrb[68].mxu1 }
 0x6e7   : > { %v3903_v29 = vpop.f32.mrb[56].mxu0  ;;  %v2324_v55 = vpop.f32.mrb[69].mxu1  ;;  %v2302_v4 = vadd.f32 %v3902_v20, %v2301_v18 }
 0x6e8   : > { %v3904_v54 = vpop.f32.mrb[57].mxu0 }
 0x6e9   : > { %v3905_v41 = vadd.f32 %v3904_v54, %v3903_v29 }
 0x6ea   : > { %v2329_v1 = vpop.f32.mrb[70].mxu1 }
 0x6eb   : > { %v3906_v11 = vpop.f32.mrb[58].mxu0  ;;  %v2331_v15 = vpop.f32.mrb[71].mxu1  ;;  %v2309_v0 = vadd.f32 %v3905_v41, %v2308_v38 }
 0x6ec   : > { %v3907_v17 = vpop.f32.mrb[59].mxu0 }
 0x6ed   : > { %v3908_v35 = vadd.f32 %v3907_v17, %v3906_v11 }
 0x6ef   : > { %v3909_v58 = vpop.f32.mrb[60].mxu0  ;;  %v3947_v40 = vpop.f32.mrb[72].mxu1  ;;  %v2316_v61 = vadd.f32 %v3908_v35, %v2315_v50 }
 0x6f0   : > { %v3910_v56 = vpop.f32.mrb[61].mxu0  ;;  %v3948_v3 = vpop.f32.mrb[73].mxu1 }
 0x6f1   : > { %v3911_v37 = vadd.f32 %v3910_v56, %v3909_v58  ;;  %v3949_v62 = vadd.f32 %v3948_v3, %v3947_v40 }
 0x6f3   : > { %v3912_v34 = vpop.f32.mrb[62].mxu0  ;;  %v3950_v28 = vpop.f32.mrb[74].mxu1  ;;  %v2323_v53 = vadd.f32 %v3911_v37, %v2322_v27 }
 0x6f4   : > { %v3913_v19 = vpop.f32.mrb[63].mxu0  ;;  %v3951_v46 = vpop.f32.mrb[75].mxu1 }
 0x6f5   : > { %v3914_v12 = vadd.f32 %v3913_v19, %v3912_v34  ;;  %v3952_v21 = vadd.f32 %v3951_v46, %v3950_v28 }
 0x6f7   : > { %v2403_v26 = vpop.f32.mrb[64].mxu0  ;;  %v3953_v36 = vpop.f32.mrb[76].mxu1  ;;  %v2330_v47 = vadd.f32 %v3914_v12, %v2329_v1 }
 0x6f8   : > { %v2404_v63 = vadd.f32 %v2403_v26, %v2281_v8  ;;  %v2405_v39 = vpop.f32.mrb[65].mxu0  ;;  %v3954_v6 = vpop.f32.mrb[77].mxu1 }
 0x6f9   : > { %v3955_v7 = vadd.f32 %v3954_v6, %v3953_v36 }
 0x6fa   : > { %v2543_v52 = vadd.f32 %v3949_v62, %v2404_v63 }
 0x6fb   : > { %v2412_v10 = vpop.f32.mrb[66].mxu0  ;;  %v3956_v13 = vpop.f32.mrb[78].mxu1 }
 0x6fc   : > { %v2413_v18 = vadd.f32 %v2412_v10, %v2288_v45  ;;  %v2414_v22 = vpop.f32.mrb[67].mxu0  ;;  %v3957_v9 = vpop.f32.mrb[79].mxu1 }
 0x6fd   : > { %v3958_v5 = vadd.f32 %v3957_v9, %v3956_v13 }
 0x6fe   : > { %v2554_v57 = vadd.f32 %v3952_v21, %v2413_v18 }
 0x6ff   : > { %v2421_v38 = vpop.f32.mrb[68].mxu0  ;;  %v3959_v44 = vpop.f32.mrb[80].mxu1 }
 0x700   : > { %v2422_v30 = vadd.f32 %v2421_v38, %v2295_v23  ;;  %v2423_v32 = vpop.f32.mrb[69].mxu0  ;;  %v3960_v43 = vpop.f32.mrb[81].mxu1 }
 0x701   : > { %v3961_v50 = vadd.f32 %v3960_v43, %v3959_v44 }
 0x702   : > { %v2565_v24 = vadd.f32 %v3955_v7, %v2422_v30 }
 0x703   : > { %v2430_v33 = vpop.f32.mrb[70].mxu0  ;;  %v3962_v8 = vpop.f32.mrb[82].mxu1 }
 0x704   : > { %v2431_v59 = vadd.f32 %v2430_v33, %v2302_v4  ;;  %v2432_v20 = vpop.f32.mrb[71].mxu0  ;;  %v3963_v27 = vpop.f32.mrb[83].mxu1 }
 0x705   : > { %v3964_v29 = vadd.f32 %v3963_v27, %v3962_v8 }
 0x706   : > { %v2576_v55 = vadd.f32 %v3958_v5, %v2431_v59 }
 0x707   : > { %v2439_v54 = vpop.f32.mrb[72].mxu0  ;;  %v3965_v45 = vpop.f32.mrb[84].mxu1 }
 0x708   : > { %v2440_v41 = vadd.f32 %v2439_v54, %v2309_v0  ;;  %v2441_v1 = vpop.f32.mrb[73].mxu0  ;;  %v3966_v11 = vpop.f32.mrb[85].mxu1 }
 0x709   : > { %v3967_v15 = vadd.f32 %v3966_v11, %v3965_v45 }
 0x70a   : > { %v2587_v17 = vadd.f32 %v3961_v50, %v2440_v41 }
 0x70b   : > { %v2448_v35 = vpop.f32.mrb[74].mxu0  ;;  %v3968_v23 = vpop.f32.mrb[86].mxu1 }
 0x70c   : > { %v2449_v58 = vadd.f32 %v2448_v35, %v2316_v61  ;;  %v2450_v40 = vpop.f32.mrb[75].mxu0  ;;  %v3969_v56 = vpop.f32.mrb[87].mxu1 }
 0x70d   : > { %v3970_v3 = vadd.f32 %v3969_v56, %v3968_v23 }
 0x70e   : > { %v2598_v37 = vadd.f32 %v3964_v29, %v2449_v58 }
 0x70f   : > { %v2457_v62 = vpop.f32.mrb[76].mxu0 }
 0x710   : > { %v2458_v4 = vadd.f32 %v2457_v62, %v2323_v53  ;;  %v4009_v34 = vpop.f32.mrb[88].mxu1  ;;  %v2459_v28 = vpop.f32.mrb[77].mxu0 }
 0x711   : > { %v4010_v19 = vpop.f32.mrb[89].mxu1 }
 0x712   : > { %v4011_v46 = vadd.f32 %v4010_v19, %v4009_v34  ;;  %v2609_v12 = vadd.f32 %v3967_v15, %v2458_v4 }
 0x713   : > { %v2466_v21 = vpop.f32.mrb[78].mxu0 }
 0x714   : > { %v2467_v0 = vadd.f32 %v2466_v21, %v2330_v47  ;;  %v4012_v26 = vpop.f32.mrb[90].mxu1  ;;  %v2468_v36 = vpop.f32.mrb[79].mxu0 }
 0x715   : > { %v4013_v63 = vpop.f32.mrb[91].mxu1 }
 0x716   : > { %v4014_v39 = vadd.f32 %v4013_v63, %v4012_v26  ;;  %v2620_v6 = vadd.f32 %v3970_v3, %v2467_v0 }
 0x717   : > { %v2691_v7 = vpop.f32.mrb[80].mxu0 }
 0x718   : > { %v2692_v61 = vadd.f32 %v2691_v7, %v2543_v52  ;;  %v4015_v10 = vpop.f32.mrb[92].mxu1  ;;  %v2693_v13 = vpop.f32.mrb[81].mxu0 }
 0x719   : > { %v4016_v18 = vpop.f32.mrb[93].mxu1 }
 0x71a   : > { %v4017_v22 = vadd.f32 %v4016_v18, %v4015_v10 }
 0x71b   : > { %v2698_v9 = vpop.f32.mrb[82].mxu0 }
 0x71c   : > { %v2699_v53 = vadd.f32 %v2698_v9, %v2554_v57  ;;  %v4018_v5 = vpop.f32.mrb[94].mxu1  ;;  %v2700_v38 = vpop.f32.mrb[83].mxu0 }
 0x71d   : > { %v4019_v44 = vpop.f32.mrb[95].mxu1 }
 0x71e   : > { %v4020_v30 = vadd.f32 %v4019_v44, %v4018_v5 }
 0x71f   : > { %v2705_v32 = vpop.f32.mrb[84].mxu0 }
 0x720   : > { %v2706_v43 = vadd.f32 %v2705_v32, %v2565_v24  ;;  %v4021_v47 = vpop.f32.mrb[96].mxu1  ;;  %v2707_v50 = vpop.f32.mrb[85].mxu0 }
 0x721   : > { %v4022_v33 = vpop.f32.mrb[97].mxu1 }
 0x722   : > { %v2827_v8 = vadd.f32 %v4011_v46, %v2706_v43  ;;  %v4023_v59 = vadd.f32 %v4022_v33, %v4021_v47 }
 0x723   : > { %v2712_v20 = vpop.f32.mrb[86].mxu0 }
 0x724   : > { %v2713_v27 = vadd.f32 %v2712_v20, %v2576_v55  ;;  %v4024_v52 = vpop.f32.mrb[98].mxu1  ;;  %v2714_v29 = vpop.f32.mrb[87].mxu0  ;;  %v5677_v46 = vmul.f32 0.00390625, %v2827_v8 }
 0x725   : > { %v4025_v54 = vpop.f32.mrb[99].mxu1 }
 0x726   : > { %v2834_v45 = vadd.f32 %v4014_v39, %v2713_v27  ;;  %v4026_v41 = vadd.f32 %v4025_v54, %v4024_v52 }
 0x727   : > { %v2719_v1 = vpop.f32.mrb[88].mxu0 }
 0x728   : > { %v2720_v57 = vadd.f32 %v2719_v1, %v2587_v17  ;;  %v2721_v11 = vpop.f32.mrb[89].mxu0  ;;  %v5681_v39 = vmul.f32 0.00390625, %v2834_v45  ;;  %v4564_v45 = vmov 37   ;;  %v4414_v1 = vld [vmem:[#allocation5] sm:$0xff] }
 0x729   : > { %4386 = vset.pattern.permute.xlu1 %v4564_v45  ;;  %4387 = vset.pattern.permute.xlu0 %v4564_v45 }
 0x72a   : > { %v2841_v15 = vadd.f32 %v4017_v22, %v2720_v57  ;;  %v2876_v9 = vmul.f32 %v5681_v39, %v5681_v39 }
 0x72b   : > { %v2726_v35 = vpop.f32.mrb[90].mxu0 }
 0x72c   : > { %v2727_v23 = vadd.f32 %v2726_v35, %v2598_v37  ;;  %v2728_v58 = vpop.f32.mrb[91].mxu0  ;;  %v2875_v37 = vmul.f32 %v5677_v46, %v5677_v46  ;;  %v4415_v35 = vld [vmem:[#allocation5 + $0x8] sm:$0xff] }
 0x72d   : > { %v4416_v58 = vld [vmem:[#allocation5 + $0x10] sm:$0xff] }
 0x72e   : > { %v2848_v24 = vadd.f32 %v4020_v30, %v2727_v23 }
 0x72f   : > { %v2733_v40 = vpop.f32.mrb[92].mxu0 }
 0x730   : > { %v2734_v56 = vadd.f32 %v2733_v40, %v2609_v12  ;;  %v2735_v3 = vpop.f32.mrb[93].mxu0  ;;  %v2870_v44 = vmul.f32 0.00390625, %v2848_v24 }
 0x732   : > { %v2855_v62 = vadd.f32 %v4023_v59, %v2734_v56  ;;  %v4417_v56 = vld [vmem:[#allocation5 + $0x18] sm:$0xff] }
 0x733   : > { %v2740_v4 = vpop.f32.mrb[94].mxu0 }
 0x734   : > { %v2741_v34 = vadd.f32 %v2740_v4, %v2620_v6  ;;  %v2742_v55 = vpop.f32.mrb[95].mxu0  ;;  %v2871_v17 = vmul.f32 0.00390625, %v2855_v62  ;;  %v2869_v6 = vmul.f32 0.00390625, %v2841_v15 }
 0x736   : > { %v2862_v28 = vadd.f32 %v4026_v41, %v2741_v34  ;;  %v2879_v10 = vsub.f32 %v2871_v17, %v2875_v37  ;;  %v4567_v17 = vmov 38  }
 0x738   : > { %v4003_v19 = vpop.f32.mrb[96].mxu0  ;;  %v2872_v13 = vmul.f32 0.00390625, %v2862_v28 }
 0x739   : > { %v4004_v21 = vpop.f32.mrb[97].mxu0 }
 0x73a   : > { %v4005_v0 = vadd.f32 %v4004_v21, %v4003_v19  ;;  %v2880_v30 = vsub.f32 %v2872_v13, %v2876_v9 }
 0x73c   : > { %v2813_v26 = vadd.f32 %v4005_v0, %v2692_v61  ;;  %v4006_v36 = vpop.f32.mrb[98].mxu0  ;;  %v2883_v61 = vmax.f32 %v2879_v10, 0.0  ;;  %v2884_v8 = vmax.f32 %v2880_v30, 0.0 }
 0x73d   : > { %v4007_v63 = vpop.f32.mrb[99].mxu0 }
 0x73e   : > { %v2865_v12 = vmul.f32 0.00390625, %v2813_v26  ;;  %v4008_v7 = vadd.f32 %v4007_v63, %v4006_v36  ;;  %v2887_v33 = vadd.f32 1e-05, %v2883_v61  ;;  %v2888_v27 = vadd.f32 1e-05, %v2884_v8 }
 0x740   : > { %v2873_v18 = vmul.f32 %v2865_v12, %v2865_v12  ;;  %v2820_v22 = vadd.f32 %v4008_v7, %v2699_v53 }
 0x742   : > { %v2877_v5 = vsub.f32 %v2869_v6, %v2873_v18  ;;  %v2866_v38 = vmul.f32 0.00390625, %v2820_v22  ;;  %v180_v6 = vld [vmem:[#allocation5 + $0x20] sm:$0x1] }
 0x743   : > { %v3010_v22 = vsel %vm1312_vm2, %v180_v6, 0 }
 0x744   : > { %v2881_v32 = vmax.f32 %v2877_v5, 0.0  ;;  %v2874_v43 = vmul.f32 %v2866_v38, %v2866_v38  ;;  %v5690_v5 = vand.u32 4294901760, %v3010_v22 }
 0x746   : > { %v2885_v47 = vadd.f32 1e-05, %v2881_v32  ;;  %v2878_v50 = vsub.f32 %v2870_v44, %v2874_v43 }
 0x748   : > { %4402 = vrsqrt.f32 %v2885_v47  ;;  %v2882_v59 = vmax.f32 %v2878_v50, 0.0  ;;  %v5695_v47 = vsub.f32 %v3010_v22, %v5690_v5 }
 0x749   : > { %4404 = vrsqrt.f32 %v2887_v33 }
 0x74a   : > { %v2886_v20 = vadd.f32 1e-05, %v2882_v59 }
 0x74c   : > { %4406 = vrsqrt.f32 %v2886_v20 }
 0x74d   : > { %4408 = vrsqrt.f32 %v2888_v27 }
 0x752   : > { %v4403_v53 = vpop.eup %4402 }
 0x753   : > { %2897 = vrot.lane.b32.xlu1 %v4403_v53, %s4563_s22  ;;  %v4405_v52 = vpop.eup %4404 }
 0x756   : > { %v4407_v29 = vpop.eup %4406 }
 0x757   : > { %2899 = vrot.lane.b32.xlu0 %v4407_v29, %s4563_s22  ;;  %2901 = vrot.lane.b32.xlu1 %v4405_v52, %s4563_s22  ;;  %v4409_v54 = vpop.eup %4408 }
 0x75b   : > { %2903 = vrot.lane.b32.xlu0 %v4409_v54, %s4563_s22 }
 0x7c5   : > { %v2898_v41 = vpop.permute.xlu1 %2897 }
 0x7c6   : > { %v2909_v57 = vmul.f32 %v4414_v1, %v2898_v41 }
 0x7c8   : > { %2917 = vrot.lane.b32.xlu1 %v2909_v57, %s4565_s23 }
 0x7c9   : > { %v2900_v11 = vpop.permute.xlu0 %2899  ;;  %v2902_v15 = vpop.permute.xlu1 %2901 }
 0x7ca   : > { %v2910_v23 = vmul.f32 %v4415_v35, %v2900_v11  ;;  %v2911_v24 = vmul.f32 %v4416_v58, %v2902_v15 }
 0x7cc   : > { %2919 = vrot.lane.b32.xlu0 %v2910_v23, %s4565_s23  ;;  %2921 = vrot.lane.b32.xlu1 %v2911_v24, %s4565_s23 }
 0x7cd   : > { %v2904_v40 = vpop.permute.xlu0 %2903 }
 0x7ce   : > { %v2912_v3 = vmul.f32 %v4417_v56, %v2904_v40 }
 0x7d0   : > { %2923 = vrot.lane.b32.xlu0 %v2912_v3, %s4565_s23 }
 0x83a   : > { %v2918_v62 = vpop.permute.xlu1 %2917 }
 0x83b   : > { %v2929_v4 = vmul.f32 %v2918_v62, %v2865_v12 }
 0x83d   : > { %2937 = vrot.lane.b32.xlu1 %v2929_v4, %s4566_s28 }
 0x83e   : > { %v2920_v34 = vpop.permute.xlu0 %2919  ;;  %v2922_v55 = vpop.permute.xlu1 %2921 }
 0x83f   : > { %v2930_v28 = vmul.f32 %v2920_v34, %v2866_v38  ;;  %v2931_v19 = vmul.f32 %v2922_v55, %v5677_v46 }
 0x841   : > { %2939 = vrot.lane.b32.xlu0 %v2930_v28, %s4566_s28  ;;  %2941 = vrot.lane.b32.xlu1 %v2931_v19, %s4566_s28 }
 0x842   : > { %v2924_v21 = vpop.permute.xlu0 %2923 }
 0x843   : > { %v2932_v0 = vmul.f32 %v2924_v21, %v5681_v39  ;;  %v5851_v39 = vmov 32  }
 0x845   : > { %2943 = vrot.lane.b32.xlu0 %v2932_v0, %s4566_s28  ;;  %2954 = vperm.xlu1 %4386, %v2909_v57   ;;  %v3087_v57 = vand.u32 4294901760, %v5695_v47 }
 0x847   : > { %v3088_v34 = vsub.f32 %v5695_v47, %v3087_v57 }
 0x849   : > { %2958 = vperm.xlu0 %4387, %v2910_v23   ;;  %2966 = vperm.xlu1 %4386, %v2912_v3  }
 0x84d   : > { %2962 = vperm.xlu0 %4387, %v2911_v24   ;;  %4388 = vset.pattern.permute.xlu1 %v4567_v17 }
 0x851   : > { %4389 = vset.pattern.permute.xlu0 %v4567_v17 }
 0x8af   : > { %v2938_v26 = vpop.permute.xlu1 %2937 }
 0x8b0   : > { %v2949_v36 = vsub.f32 %v4414_v1, %v2938_v26 }
 0x8b2   : > { %2979 = vperm.xlu1 %4388, %v2949_v36  }
 0x8b3   : > { %v2940_v37 = vpop.permute.xlu0 %2939  ;;  %v2942_v63 = vpop.permute.xlu1 %2941 }
 0x8b4   : > { %v2950_v12 = vsub.f32 %v4415_v35, %v2940_v37  ;;  %v2951_v46 = vsub.f32 %v4416_v58, %v2942_v63 }
 0x8b6   : > { %2984 = vperm.xlu1 %4388, %v2950_v12   ;;  %2989 = vperm.xlu0 %4389, %v2951_v46  }
 0x8b7   : > { %v2944_v7 = vpop.permute.xlu0 %2943 }
 0x8b8   : > { %v2952_v10 = vsub.f32 %v4417_v56, %v2944_v7 }
 0x8ba   : > { %2994 = vperm.xlu1 %4388, %v2952_v10   ;;  %4391 = vset.pattern.permute.xlu0 %v5851_v39 }
 0x8be   : > { %4390 = vset.pattern.permute.xlu1 %v5851_v39 }
 0x8bf   : > { %3007 = vperm.xlu1 %4390, %v180_v6  }
 0x8c4   : > { %v2955_v13 = vpop.permute.xlu1 %2954 }
 0x8c5   : > { %v2969_v38 = vmul.f32 %v2955_v13, %v5338_v51  ;;  %v2970_v61 = vmul.f32 %v2955_v13, %v5340_v42 }
 0x8c8   : > { %v2959_v18 = vpop.permute.xlu0 %2958  ;;  %v2967_v9 = vpop.permute.xlu1 %2966 }
 0x8c9   : > { %v2971_v20 = vmul.f32 %v2959_v18, %v5358_v14  ;;  %v2972_v27 = vmul.f32 %v2959_v18, %v5360_v16  ;;  %v2976_v14 = vmul.f32 %v2967_v9, %v5430_v25 }
 0x8cc   : > { %v2963_v44 = vpop.permute.xlu0 %2962 }
 0x8cd   : > { %v2973_v50 = vmul.f32 %v2963_v44, %v5382_v48  ;;  %v2974_v33 = vmul.f32 %v2963_v44, %v5398_v60  ;;  %v2975_v48 = vmul.f32 %v2967_v9, %v5419_v49  ;;  %v3089_v44 = vand.u32 4294901760, %v3088_v34 }
 0x931   : > { %v2980_v30 = vpop.permute.xlu1 %2979 }
 0x932   : > { %v2997_v32 = vadd.f32 %v2980_v30, %v2969_v38  ;;  %v2998_v43 = vadd.f32 %v2980_v30, %v2970_v61 }
 0x934   : > { %v3012_v8 = vand.u32 4294901760, %v2998_v43  ;;  %v3014_v59 = vand.u32 4294901760, %v2997_v32 }
 0x935   : > { %v2990_v51 = vpop.permute.xlu0 %2989  ;;  %v2985_v53 = vpop.permute.xlu1 %2984 }
 0x936   : > { %v5701_v42 = vsub.f32 %v2998_v43, %v3012_v8  ;;  %v5703_v52 = vsub.f32 %v2997_v32, %v3014_v59  ;;  %v3001_v29 = vadd.f32 %v2990_v51, %v2973_v50  ;;  %v3002_v54 = vadd.f32 %v2990_v51, %v2974_v33 }
 0x937   : > { %v2999_v45 = vadd.f32 %v2985_v53, %v2971_v20  ;;  %v3000_v41 = vadd.f32 %v2985_v53, %v2972_v27 }
 0x938   : > { %v3020_v1 = vand.u32 4294901760, %v3002_v54  ;;  %v3022_v60 = vand.u32 4294901760, %v3001_v29  ;;  %v3098_v16 = vand.u32 4294901760, %v5701_v42  ;;  %v3104_v23 = vand.u32 4294901760, %v5703_v52 }
 0x939   : > { %v3016_v11 = vand.u32 4294901760, %v3000_v41  ;;  %v3018_v15 = vand.u32 4294901760, %v2999_v45  ;;  %v2995_v35 = vpop.permute.xlu1 %2994 }
 0x93a   : > { %v5710_v58 = vsub.f32 %v3002_v54, %v3020_v1  ;;  %v5712_v24 = vsub.f32 %v3001_v29, %v3022_v60  ;;  %v3003_v40 = vadd.f32 %v2995_v35, %v2975_v48  ;;  %v3004_v3 = vadd.f32 %v2995_v35, %v2976_v14 }
 0x93b   : > { %v5714_v56 = vsub.f32 %v3000_v41, %v3016_v11  ;;  %v5716_v49 = vsub.f32 %v2999_v45, %v3018_v15  ;;  %v5719_v25 = vpack.c.bf16 %v3018_v15, %v3014_v59  ;;  %v5726_v21 = vpack.c.bf16 %v3016_v11, %v3012_v8 }
 0x93c   : > { %v3122_v62 = vand.u32 4294901760, %v5710_v58  ;;  %v3026_v4 = vand.u32 4294901760, %v3003_v40  ;;  %v3024_v19 = vand.u32 4294901760, %v3004_v3  ;;  %v3105_v0 = vsub.f32 %v5703_v52, %v3104_v23 }
 0x93d   : > { %v3110_v55 = vand.u32 4294901760, %v5714_v56  ;;  %v3116_v28 = vand.u32 4294901760, %v5716_v49  ;;  %v3128_v17 = vand.u32 4294901760, %v5712_v24  ;;  %v3099_v36 = vsub.f32 %v5701_v42, %v3098_v16  ;;  %4172 = vmatprep.subr.bf16.mxu0 %v5726_v21 }
 0x93e   : > { %v3139_v26 = vsub.f32 %v3003_v40, %v3026_v4  ;;  %v3133_v63 = vsub.f32 %v3004_v3, %v3024_v19  ;;  %v4175_v12 = vpack.c.bf16 %v3024_v19, %v3020_v1  ;;  %v4177_v7 = vpack.c.bf16 %v3026_v4, %v3022_v60  ;;  %4174 = vmatpush1.bf16.msra.mxu0 %v5719_v25 }
 0x93f   : > { %v3117_v37 = vsub.f32 %v5716_v49, %v3116_v28  ;;  %v3111_v46 = vsub.f32 %v5714_v56, %v3110_v55  ;;  %v3100_v39 = vand.u32 4294901760, %v3099_v36  ;;  %v3123_v22 = vsub.f32 %v5710_v58, %v3122_v62 }
 0x940   : > { %v3140_v10 = vand.u32 4294901760, %v3139_v26  ;;  %v3134_v13 = vand.u32 4294901760, %v3133_v63  ;;  %4176 = vmatprep.subr.bf16.mxu0 %v4175_v12  ;;  %v3106_v9 = vand.u32 4294901760, %v3105_v0  ;;  %v3129_v38 = vsub.f32 %v5712_v24, %v3128_v17 }
 0x941   : > { %v3118_v6 = vand.u32 4294901760, %v3117_v37  ;;  %v3112_v18 = vand.u32 4294901760, %v3111_v46  ;;  %v3124_v33 = vand.u32 4294901760, %v3123_v22  ;;  %v4187_v51 = vpack.c.bf16 %v5714_v56, %v5701_v42 }
 0x942   : > { %v3141_v61 = vsub.f32 %v3139_v26, %v3140_v10  ;;  %v3135_v32 = vsub.f32 %v3133_v63, %v3134_v13  ;;  %4178 = vmatpush1.bf16.msra.mxu0 %v4177_v7  ;;  %v3130_v59 = vand.u32 4294901760, %v3129_v38  ;;  %v4189_v53 = vpack.c.bf16 %v5716_v49, %v5703_v52  ;;  %v3008_v52 = vpop.permute.xlu1 %3007 }
 0x943   : > { %v4179_v30 = vpack.c.bf16 %v3112_v18, %v3100_v39  ;;  %v4181_v50 = vpack.c.bf16 %v3118_v6, %v3106_v9  ;;  %v4191_v29 = vpack.c.bf16 %v3133_v63, %v5710_v58  ;;  %v4193_v54 = vpack.c.bf16 %v3139_v26, %v5712_v24 }
 0x944   : > { %v3142_v43 = vand.u32 4294901760, %v3141_v61  ;;  %v3136_v8 = vand.u32 4294901760, %v3135_v32  ;;  %v4203_v45 = vpack.c.bf16 %v3110_v55, %v3098_v16  ;;  %v4205_v41 = vpack.c.bf16 %v3116_v28, %v3104_v23 }
 0x945   : > { %4180 = vmatprep.subr.bf16.mxu0 %v4179_v30  ;;  %3090 = vmatmul.mubr.f32.vlgmr.msra.gmra.mrb[100].mxu0 %v3089_v44  ;;  %v4207_v48 = vpack.c.bf16 %v3134_v13, %v3122_v62  ;;  %v4209_v1 = vpack.c.bf16 %v3140_v10, %v3128_v17  ;;  %v5852_v23 = vlaneseq }
 0x946   : > { %v4183_v20 = vpack.c.bf16 %v3136_v8, %v3124_v33  ;;  %4182 = vmatpush1.bf16.msra.mxu0 %v4181_v50  ;;  %v4185_v27 = vpack.c.bf16 %v3142_v43, %v3130_v59  ;;  %3200 = vmatprep.mubr.f32.mxu0 %v4556_v31 }
 0x947   : > { %vm3575_vm3 = vcmp.lt.s32.totalorder %v5852_v23, 256 }
 0x948   : > { %4184 = vmatprep.subr.bf16.mxu0 %v4183_v20 }
 0x94a   : > { %4186 = vmatpush1.bf16.msra.mxu0 %v4185_v27 }
 0x94b   : > { %4188 = vmatprep.subr.bf16.mxu0 %v4187_v51 }
 0x94d   : > { %3202 = vmatmul.mubr.f32.vlgmr.msra.gmra.mrb[100].mxu0 %v5690_v5 }
 0x94e   : > { %4190 = vmatpush1.bf16.msra.mxu0 %v4189_v53  ;;  %3288 = vmatprep.mubr.f32.mxu0 %v4556_v31 }
 0x94f   : > { %4192 = vmatprep.subr.bf16.mxu0 %v4191_v29 }
 0x952   : > { %4194 = vmatpush1.bf16.msra.mxu0 %v4193_v54 }
 0x953   : > { %4196 = vmatprep.subr.bf16.mxu0 %v5726_v21 }
 0x955   : > { %3291 = vmatmul.mubr.f32.vlgmr.msra.gmra.mrb[100].mxu0 %v5695_v47  ;;  %v4568_v47 = vmov 1966171168  }
 0x956   : > { %4198 = vmatpush1.bf16.msra.mxu0 %v5719_v25  ;;  %3369 = vmatprep.mubr.f32.mxu0 %v4556_v31  ;;  %v3559_v42 = vunpack.c.l.s4 %v4568_v47 }
 0x957   : > { %4200 = vmatprep.subr.bf16.mxu0 %v4175_v12 }
 0x958   : > { %v3560_v60 = vunpack.c.0.s8 %v3559_v42 }
 0x95a   : > { %4202 = vmatpush1.bf16.msra.mxu0 %v4177_v7  ;;  %v3563_v15 = vsub.s32 %v3560_v60, %v4729_v2 }
 0x95b   : > { %4204 = vmatprep.subr.bf16.mxu0 %v4203_v45 }
 0x95d   : > { %3373 = vmatmul.mubr.f32.vlgmr.msra.gmra.mrb[100].mxu0 %v3087_v57 }
 0x95e   : > { %4206 = vmatpush1.bf16.msra.mxu0 %v4205_v41  ;;  %3467 = vmatprep.mubr.f32.mxu0 %v4556_v31 }
 0x95f   : > { %4208 = vmatprep.subr.bf16.mxu0 %v4207_v48 }
 0x962   : > { %4210 = vmatpush1.bf16.msra.mxu0 %v4209_v1 }
 0x963   : > { %4212 = vmatprep.subr.bf16.mxu0 %v5726_v21 }
 0x965   : > { %3469 = vmatmul.mubr.f32.vlgmr.msra.gmra.mrb[100].mxu0 %v5690_v5 }
 0x966   : > { %4214 = vmatpush1.bf16.msra.mxu0 %v5719_v25  ;;  %3547 = vmatprep.mubr.f32.mxu0 %v4556_v31 }
 0x967   : > { %4216 = vmatprep.subr.bf16.mxu0 %v4175_v12 }
 0x96a   : > { %4218 = vmatpush1.bf16.msra.mxu0 %v4177_v7 }
 0x96d   : > { %3549 = vmatmul.mubr.f32.vlgmr.msra.gmra.mrb[100].mxu0 %v5690_v5 }
 0xa40   : > { %v3550_v57 = vpop.f32.mrb[100].mxu0 }
 0xa41   : > { %v4243_v14 = vadd.f32 %v3550_v57, %v3008_v52  ;;  %v3552_v16 = vpop.f32.mrb[101].mxu0 }
 0xa42   : > { %v4244_v11 = vadd.f32 %v3552_v16, %v3008_v52 }
 0xa44   : > { %v3557_v35 = vcombine.low %v4243_v14, %v4244_v11 }
 0xa46   : > { %v3564_v31 = vrot.slane %v3557_v35, %v3563_v15 }
 0xa48   : > { %v3571_v5 = vrot.slane %v3564_v31, %v3563_v15 }
 0xa4a   : > { %3577 = vst.msk [vmem:[%s174_s3] sm:$0x3] %vm3575_vm3, %v3571_v5 }
 0xa4b   : > { %4489 = shalt.err (!%p4486_p7)
}
 0xa4c   : > { %s4490_s20 = scalar_lea.hbm %s5778_s7, 32  ;;  %s4494_s15 = scalar_lea.hbm %s5823_s2, 128 }
 0xa4d   : > { %p4491_p9 = scmp.ne.s32.totalorder %s5778_s7, %s4490_s20  ;;  %p4495_p0 = scmp.lt.u32.totalorder %s5778_s7, %s5823_s2 }
 0xa4e   : > { %p4496_p10 = scmp.lt.u32.totalorder %s4494_s15, %s4490_s20  ;;  %p4498_p1 = scmp.lt.u32.totalorder %s4490_s20, %s5778_s7 }
 0xa4f   : > { %p4492_p11 = pnand %p4491_p9, %p4668_p12 }
 0xa50   : > { %p4497_p2 = por %p4496_p10, %p4495_p0 }
 0xa51   : > { %p4493_p5 = pneg %p4492_p11 }
 0xa52   : > { %p4499_p4 = por %p4498_p1, %p4497_p2 }
 0xa54   : > { %p4500_p6 = pnand %p4499_p4, %p4493_p5 }
 0xa56   : > { %4503 = shalt.err (!%p4500_p6)
}
 0xa57   : > { %4301 = dma.vmem_to_hbm [thread:$0]  (%p4668_p12), %s5780_s4, 32, %s5778_s7, %s3579_s18  }
 0xa58 PF: > { %p4318_p8 = scmp.ge.s32.totalorder %s4546_s12, 2  ;;  %s3605_s22 = sand.u32 1, %s4534_s9  }
 0xa59   : > { %p5853_p13 = scmp.ne.s32.totalorder %s5836_s16, 0  ;;  %s3606_s23 = scalar_lea.sflag [#allocation4], %s3605_s22 }
 0xa5b   : > { %p4312_p3 = pnand %p4318_p8, %p5853_p13 }
 0xa5d   : > { %4529 = dma.done.wait (!%p4312_p3), %s3606_s23, 32  }
 0xa5e   : > { %4531 = vsyncadd (!%p4312_p3), %s3606_s23, 4294967264  ;;  %p16_p7 = scmp.ge.s32.totalorder %s4638_s21, 6   ;;  %s5854_s9 = smov %s4538_s10 }
 0xa5f   : > { %s5855_s10 = smov %s4542_s11  ;;  %s5856_s11 = smov %s4664_s8 }
 0xa60   : > { %s5857_s12 = smov %s4638_s21  ;;  %18 = sbr.rel (!%p16_p7) target bundleno = 6 (0x6), region = 77 }
 0xa67   :  { %3611 = vsyncpa [#allocation3], 1 }
 0xa68   :  { %3613 = vsyncpa [#allocation3 + $0x1], 1 }
 0xa69   :  { %3614 = vsyncpa [#allocation6], 1 }
 0xa6a   :  { %3615 = vsyncpa [#allocation4], 1 }
 0xa6b   :  { %3617 = vsyncpa [#allocation4 + $0x1], 1 }

</bundles_post_ra>
